<compile_context>
chip_gen: v6e
topology: v6e:2x2x1
jax: 0.10.0
libtpu: 0.0.40
codegen_flags: <defaults>
</compile_context>

<pallas_src>
import jax
import jax.numpy as jnp
from jax import lax
from jax.experimental import pallas as pl
from jax.experimental.pallas import tpu as pltpu

NUM_FEATURES = 16
DIM = 32
NUM_GC_LAYERS = 3       # must be >= 2 (module raises otherwise)
N_NODES = 32            # nodes per loader batch
N_EDGES = 64            # edges per loader batch
N_GRAPHS = 4            # graphs per loader batch
B_LOADER = 8            # loader batches processed per pallas_call
BN_EPS = 1e-5           # torch.nn.BatchNorm1d default eps
NORM_EPS = 1e-12        # F.normalize default eps
GIN_EPS = 0.0           # GINConv default eps (train_eps=False)

EMB_DIM = NUM_GC_LAYERS * DIM                       # 96
OUT_PAD = ((EMB_DIM + 127) // 128) * 128            # 128, lane-dense store width


def gnn_pregraph_kernel(x_ref, a_ref, p_ref, w1_ref, b1_ref, w2_ref, b2_ref,
                        gamma_ref, beta_ref, out_ref):
    x = x_ref[...]          # [N, DIM]   (layer-0 features, zero-padded to DIM)
    A_hat = a_ref[...]      # [N, N]     = A + (1 + GIN_EPS) * I
    feats = []
    for l in range(NUM_GC_LAYERS):          # static unroll over GIN layers
        # GINConv: nn((1 + eps) * x_i + sum_{j in N(i)} x_j) == nn(A_hat @ x)
        h = jnp.dot(A_hat, x, preferred_element_type=jnp.float32)
        # nn = Linear -> ReLU -> Linear
        h = jnp.dot(h, w1_ref[l], preferred_element_type=jnp.float32) + b1_ref[l]
        h = jnp.maximum(h, 0.0)
        h = jnp.dot(h, w2_ref[l], preferred_element_type=jnp.float32) + b2_ref[l]
        # F.relu(conv(x))
        h = jnp.maximum(h, 0.0)
        # BatchNorm1d over nodes (training-mode batch stats, biased variance)
        mean = jnp.mean(h, axis=0, keepdims=True)
        var = jnp.mean((h - mean) ** 2, axis=0, keepdims=True)
        x = (h - mean) * lax.rsqrt(var + BN_EPS) * gamma_ref[l] + beta_ref[l]
        feats.append(x)
    # Zero-pad the concatenated features to a lane-dense 128-wide slab, then do
    # all three global_add_pool's as ONE matmul on the concatenation.
    if OUT_PAD > EMB_DIM:
        feats.append(jnp.zeros((N_NODES, OUT_PAD - EMB_DIM), jnp.float32))
    H = jnp.concatenate(feats, axis=1)                     # [N, OUT_PAD]
    pooled = jnp.dot(p_ref[...], H,
                     preferred_element_type=jnp.float32)   # [G, OUT_PAD]
    # torch.cat(xpool, 1) followed by F.normalize(x, dim=1):
    #   x / max(||x||, eps)  ==  x * rsqrt(max(||x||^2, eps^2))
    sumsq = jnp.sum(pooled * pooled, axis=1, keepdims=True)
    out_ref[...] = pooled * lax.rsqrt(jnp.maximum(sumsq, NORM_EPS * NORM_EPS))
    # TODO(synk): proj_head (Linear->ReLU->Linear) output `y` is computed in
    # Encoder_Core.in_forward but discarded by GNN_pregraph.forward (only the
    # normalized pooled embedding `emb` is returned), so it is omitted here.


def _build_dense(x, edge_index, batch):
    """Per-loader-batch dense operands: padded features, A_hat, pooling matrix."""
    N = x.shape[0]
    A = jnp.zeros((N, N), jnp.float32).at[edge_index[1], edge_index[0]].add(1.0)
    A_hat = A + (1.0 + GIN_EPS) * jnp.eye(N, dtype=jnp.float32)  # fold self term
    P = jax.nn.one_hot(batch, N_GRAPHS, dtype=jnp.float32).T     # [G, N]
    x_pad = jnp.zeros((N, DIM), jnp.float32).at[:, :x.shape[1]].set(x)
    return x_pad, A_hat, P


def gnn_pregraph_forward(x, edge_index, batch, params, labels):
    """Mirrors GNN_pregraph.forward over a loader of B stacked batches:
    returns (representTu [B*G, L*DIM], label [B*G])."""
    B = x.shape[0]
    x_pad, A_hat, P = jax.vmap(_build_dense)(x, edge_index, batch)

    W1, b1, W2, b2, gamma, beta = (params[k] for k in
                                   ("W1", "b1", "W2", "b2", "gamma", "beta"))

    grid_spec = pltpu.PrefetchScalarGridSpec(
        num_scalar_prefetch=0,
        grid=(B,),
        in_specs=[
            # per-batch operands: leading batch axis squeezed out
            pl.BlockSpec((None, N_NODES, DIM), lambda b: (b, 0, 0)),
            pl.BlockSpec((None, N_NODES, N_NODES), lambda b: (b, 0, 0)),
            pl.BlockSpec((None, N_GRAPHS, N_NODES), lambda b: (b, 0, 0)),
            # shared parameters: same (resident) block for every grid step
            pl.BlockSpec(W1.shape, lambda b: (0, 0, 0)),
            pl.BlockSpec(b1.shape, lambda b: (0, 0, 0)),
            pl.BlockSpec(W2.shape, lambda b: (0, 0, 0)),
            pl.BlockSpec(b2.shape, lambda b: (0, 0, 0)),
            pl.BlockSpec(gamma.shape, lambda b: (0, 0, 0)),
            pl.BlockSpec(beta.shape, lambda b: (0, 0, 0)),
        ],
        out_specs=pl.BlockSpec((None, N_GRAPHS, OUT_PAD), lambda b: (b, 0, 0)),
    )

    out = pl.pallas_call(
        gnn_pregraph_kernel,
        out_shape=jax.ShapeDtypeStruct((B, N_GRAPHS, OUT_PAD), jnp.float32),
        grid_spec=grid_spec,
        compiler_params=pltpu.CompilerParams(
            dimension_semantics=("parallel",)),      # shard batches on v7x TCs
    )(x_pad, A_hat, P, W1, b1, W2, b2, gamma, beta)

    # Drop lane padding and flatten, mirroring torch.cat((ret, emb)) over the
    # loader.
    emb = out[:, :, :EMB_DIM].reshape(B * N_GRAPHS, EMB_DIM)
    return emb, labels.reshape(B * N_GRAPHS)


def make_params(key):
    """Deterministic synthetic parameters matching Encoder_Core's shapes."""
    ks = jax.random.split(key, 6 * NUM_GC_LAYERS)
    W1 = jnp.zeros((NUM_GC_LAYERS, DIM, DIM), jnp.float32)
    W2 = jnp.zeros((NUM_GC_LAYERS, DIM, DIM), jnp.float32)
    b1 = jnp.zeros((NUM_GC_LAYERS, 1, DIM), jnp.float32)
    b2 = jnp.zeros((NUM_GC_LAYERS, 1, DIM), jnp.float32)
    gamma = jnp.zeros((NUM_GC_LAYERS, 1, DIM), jnp.float32)
    beta = jnp.zeros((NUM_GC_LAYERS, 1, DIM), jnp.float32)
    for l in range(NUM_GC_LAYERS):
        in_dim = NUM_FEATURES if l == 0 else DIM
        w1_raw = 0.1 * jax.random.normal(ks[6 * l + 0], (in_dim, DIM), jnp.float32)
        # zero-padded rows for layer 0 so padded features contribute nothing
        W1 = W1.at[l, :in_dim, :].set(w1_raw)
        W2 = W2.at[l].set(0.1 * jax.random.normal(ks[6 * l + 1], (DIM, DIM),
                                                  jnp.float32))
        b1 = b1.at[l, 0].set(0.1 * jax.random.normal(ks[6 * l + 2], (DIM,),
                                                     jnp.float32))
        b2 = b2.at[l, 0].set(0.1 * jax.random.normal(ks[6 * l + 3], (DIM,),
                                                     jnp.float32))
        gamma = gamma.at[l, 0].set(
            1.0 + 0.05 * jax.random.normal(ks[6 * l + 4], (DIM,), jnp.float32))
        beta = beta.at[l, 0].set(
            0.05 * jax.random.normal(ks[6 * l + 5], (DIM,), jnp.float32))
    return dict(W1=W1, b1=b1, W2=W2, b2=b2, gamma=gamma, beta=beta)


def _reference_single(x, edge_index, batch, params):
    """Pure-JAX reference for one loader batch (identical semantics)."""
    N = x.shape[0]
    A = jnp.zeros((N, N), jnp.float32).at[edge_index[1], edge_index[0]].add(1.0)
    P = jax.nn.one_hot(batch, N_GRAPHS, dtype=jnp.float32).T
    h = jnp.zeros((N, DIM), jnp.float32).at[:, :x.shape[1]].set(x)
    pooled = []
    for l in range(NUM_GC_LAYERS):
        z = (1.0 + GIN_EPS) * h + A @ h
        z = jnp.maximum(z @ params["W1"][l] + params["b1"][l], 0.0)
        z = z @ params["W2"][l] + params["b2"][l]
        z = jnp.maximum(z, 0.0)
        mean = jnp.mean(z, axis=0, keepdims=True)
        var = jnp.mean((z - mean) ** 2, axis=0, keepdims=True)
        h = (z - mean) / jnp.sqrt(var + BN_EPS) * params["gamma"][l] + params["beta"][l]
        pooled.append(P @ h)
    full = jnp.concatenate(pooled, axis=1)
    norm = jnp.sqrt(jnp.sum(full * full, axis=1, keepdims=True))
    return full / jnp.maximum(norm, NORM_EPS)


def reference_forward(x, edge_index, batch, params, labels):
    emb = jax.vmap(lambda xx, ee, bb: _reference_single(xx, ee, bb, params))(
        x, edge_index, batch)
    return emb.reshape(-1, EMB_DIM), labels.reshape(-1)


if __name__ == "__main__":
    key = jax.random.PRNGKey(0)
    kx, ke1, ke2, ky, kp = jax.random.split(key, 5)

    # A "loader" of B_LOADER data batches stacked along a leading axis:
    # node features, edges, graph ids, labels per batch.
    x = jax.random.normal(kx, (B_LOADER, N_NODES, NUM_FEATURES), jnp.float32)
    src = jax.random.randint(ke1, (B_LOADER, N_EDGES), 0, N_NODES)
    dst = jax.random.randint(ke2, (B_LOADER, N_EDGES), 0, N_NODES)
    edge_index = jnp.stack([src, dst], axis=1).astype(jnp.int32)     # [B, 2, E]
    batch = jnp.broadcast_to(
        jnp.repeat(jnp.arange(N_GRAPHS, dtype=jnp.int32),
                   N_NODES // N_GRAPHS),
        (B_LOADER, N_NODES))                                         # [B, N]
    labels = jax.random.randint(ky, (B_LOADER, N_GRAPHS), 0, 2).astype(jnp.float32)

    params = make_params(kp)

    represent, lab = gnn_pregraph_forward(x, edge_index, batch, params, labels)
    represent = jax.block_until_ready(represent)

    ref, ref_lab = reference_forward(x, edge_index, batch, params, labels)
    assert represent.shape == (B_LOADER * N_GRAPHS, EMB_DIM)
    assert lab.shape == (B_LOADER * N_GRAPHS,)
    assert jnp.allclose(represent, ref, rtol=1e-4, atol=1e-4)
    assert jnp.allclose(lab, ref_lab)

    print("KERNEL_OK")
</pallas_src>

<mosaic_0001>
module attributes {stable_mosaic.version = 11 : i64} {
  func.func @gnn_pregraph_kernel(%arg0: i32, %arg1: memref<1x32x32xf32, #tpu.memory_space<vmem>>, %arg2: memref<1x32x32xf32, #tpu.memory_space<vmem>>, %arg3: memref<1x4x32xf32, #tpu.memory_space<vmem>>, %arg4: memref<3x32x32xf32, #tpu.memory_space<vmem>>, %arg5: memref<3x1x32xf32, #tpu.memory_space<vmem>>, %arg6: memref<3x32x32xf32, #tpu.memory_space<vmem>>, %arg7: memref<3x1x32xf32, #tpu.memory_space<vmem>>, %arg8: memref<3x1x32xf32, #tpu.memory_space<vmem>>, %arg9: memref<3x1x32xf32, #tpu.memory_space<vmem>>, %arg10: memref<1x4x128xf32, #tpu.memory_space<vmem>>) attributes {dimension_semantics = [#tpu.dimension_semantics<parallel>], iteration_bounds = array<i64: 8>, scalar_prefetch = 0 : i64, scratch_operands = 0 : i64, tpu.core_type = #tpu.core_type<tc>, window_params = [{transform_indices = @transform_0, window_bounds = array<i64: 1, 32, 32>}, {transform_indices = @transform_1, window_bounds = array<i64: 1, 32, 32>}, {transform_indices = @transform_2, window_bounds = array<i64: 1, 4, 32>}, {pipeline_mode = #tpu.pipeline_mode<synchronous>, transform_indices = @transform_3, window_bounds = array<i64: 3, 32, 32>}, {pipeline_mode = #tpu.pipeline_mode<synchronous>, transform_indices = @transform_4, window_bounds = array<i64: 3, 1, 32>}, {pipeline_mode = #tpu.pipeline_mode<synchronous>, transform_indices = @transform_5, window_bounds = array<i64: 3, 32, 32>}, {pipeline_mode = #tpu.pipeline_mode<synchronous>, transform_indices = @transform_6, window_bounds = array<i64: 3, 1, 32>}, {pipeline_mode = #tpu.pipeline_mode<synchronous>, transform_indices = @transform_7, window_bounds = array<i64: 3, 1, 32>}, {pipeline_mode = #tpu.pipeline_mode<synchronous>, transform_indices = @transform_8, window_bounds = array<i64: 3, 1, 32>}, {transform_indices = @transform_9, window_bounds = array<i64: 1, 4, 128>}]} {
    %c0 = arith.constant 0 : index
    %c0_0 = arith.constant 0 : index
    %c0_1 = arith.constant 0 : index
    %0 = vector.load %arg1[%c0, %c0_0, %c0_1] : memref<1x32x32xf32, #tpu.memory_space<vmem>>, vector<1x32x32xf32>
    %1 = vector.shape_cast %0 : vector<1x32x32xf32> to vector<32x32xf32>
    %c0_2 = arith.constant 0 : index
    %c0_3 = arith.constant 0 : index
    %c0_4 = arith.constant 0 : index
    %2 = vector.load %arg2[%c0_2, %c0_3, %c0_4] : memref<1x32x32xf32, #tpu.memory_space<vmem>>, vector<1x32x32xf32>
    %3 = vector.shape_cast %2 : vector<1x32x32xf32> to vector<32x32xf32>
    %cst = arith.constant dense<0.000000e+00> : vector<32x32xf32>
    %4 = tpu.matmul %3, %1, %cst {dimension_numbers = #tpu.dot_dimension_numbers<[1], [0], [0], [1], [0, 0, 1, 1], [], []>} : vector<32x32xf32>, vector<32x32xf32>, vector<32x32xf32> -> vector<32x32xf32>
    %c0_5 = arith.constant 0 : index
    %c0_6 = arith.constant 0 : index
    %c0_7 = arith.constant 0 : index
    %5 = vector.load %arg4[%c0_5, %c0_6, %c0_7] : memref<3x32x32xf32, #tpu.memory_space<vmem>>, vector<1x32x32xf32>
    %6 = vector.shape_cast %5 : vector<1x32x32xf32> to vector<32x32xf32>
    %cst_8 = arith.constant dense<0.000000e+00> : vector<32x32xf32>
    %7 = tpu.matmul %4, %6, %cst_8 {dimension_numbers = #tpu.dot_dimension_numbers<[1], [0], [0], [1], [0, 0, 1, 1], [], []>} : vector<32x32xf32>, vector<32x32xf32>, vector<32x32xf32> -> vector<32x32xf32>
    %c0_9 = arith.constant 0 : index
    %c0_10 = arith.constant 0 : index
    %c0_11 = arith.constant 0 : index
    %8 = vector.load %arg5[%c0_9, %c0_10, %c0_11] : memref<3x1x32xf32, #tpu.memory_space<vmem>>, vector<1x1x32xf32>
    %9 = vector.shape_cast %8 : vector<1x1x32xf32> to vector<1x32xf32>
    %10 = vector.broadcast %9 : vector<1x32xf32> to vector<32x32xf32>
    %11 = arith.addf %7, %10 : vector<32x32xf32>
    %cst_12 = arith.constant 0.000000e+00 : f32
    %12 = vector.broadcast %cst_12 : f32 to vector<32x32xf32>
    %13 = arith.maximumf %11, %12 : vector<32x32xf32>
    %c0_13 = arith.constant 0 : index
    %c0_14 = arith.constant 0 : index
    %c0_15 = arith.constant 0 : index
    %14 = vector.load %arg6[%c0_13, %c0_14, %c0_15] : memref<3x32x32xf32, #tpu.memory_space<vmem>>, vector<1x32x32xf32>
    %15 = vector.shape_cast %14 : vector<1x32x32xf32> to vector<32x32xf32>
    %cst_16 = arith.constant dense<0.000000e+00> : vector<32x32xf32>
    %16 = tpu.matmul %13, %15, %cst_16 {dimension_numbers = #tpu.dot_dimension_numbers<[1], [0], [0], [1], [0, 0, 1, 1], [], []>} : vector<32x32xf32>, vector<32x32xf32>, vector<32x32xf32> -> vector<32x32xf32>
    %c0_17 = arith.constant 0 : index
    %c0_18 = arith.constant 0 : index
    %c0_19 = arith.constant 0 : index
    %17 = vector.load %arg7[%c0_17, %c0_18, %c0_19] : memref<3x1x32xf32, #tpu.memory_space<vmem>>, vector<1x1x32xf32>
    %18 = vector.shape_cast %17 : vector<1x1x32xf32> to vector<1x32xf32>
    %19 = vector.broadcast %18 : vector<1x32xf32> to vector<32x32xf32>
    %20 = arith.addf %16, %19 : vector<32x32xf32>
    %cst_20 = arith.constant 0.000000e+00 : f32
    %21 = vector.broadcast %cst_20 : f32 to vector<32x32xf32>
    %22 = arith.maximumf %20, %21 : vector<32x32xf32>
    %cst_21 = arith.constant dense<0.000000e+00> : vector<32xf32>
    %23 = vector.multi_reduction <add>, %22, %cst_21 [0] : vector<32x32xf32> to vector<32xf32>
    %24 = vector.shape_cast %23 : vector<32xf32> to vector<1x32xf32>
    %cst_22 = arith.constant 3.200000e+01 : f32
    %25 = vector.broadcast %cst_22 : f32 to vector<1x32xf32>
    %26 = arith.divf %24, %25 : vector<1x32xf32>
    %27 = vector.broadcast %26 : vector<1x32xf32> to vector<32x32xf32>
    %28 = arith.subf %22, %27 : vector<32x32xf32>
    %29 = arith.mulf %28, %28 : vector<32x32xf32>
    %cst_23 = arith.constant dense<0.000000e+00> : vector<32xf32>
    %30 = vector.multi_reduction <add>, %29, %cst_23 [0] : vector<32x32xf32> to vector<32xf32>
    %31 = vector.shape_cast %30 : vector<32xf32> to vector<1x32xf32>
    %cst_24 = arith.constant 3.200000e+01 : f32
    %32 = vector.broadcast %cst_24 : f32 to vector<1x32xf32>
    %33 = arith.divf %31, %32 : vector<1x32xf32>
    %34 = vector.broadcast %26 : vector<1x32xf32> to vector<32x32xf32>
    %35 = arith.subf %22, %34 : vector<32x32xf32>
    %cst_25 = arith.constant 9.99999974E-6 : f32
    %36 = vector.broadcast %cst_25 : f32 to vector<1x32xf32>
    %37 = arith.addf %33, %36 : vector<1x32xf32>
    %38 = math.rsqrt %37 : vector<1x32xf32>
    %39 = vector.broadcast %38 : vector<1x32xf32> to vector<32x32xf32>
    %40 = arith.mulf %35, %39 : vector<32x32xf32>
    %c0_26 = arith.constant 0 : index
    %c0_27 = arith.constant 0 : index
    %c0_28 = arith.constant 0 : index
    %41 = vector.load %arg8[%c0_26, %c0_27, %c0_28] : memref<3x1x32xf32, #tpu.memory_space<vmem>>, vector<1x1x32xf32>
    %42 = vector.shape_cast %41 : vector<1x1x32xf32> to vector<1x32xf32>
    %43 = vector.broadcast %42 : vector<1x32xf32> to vector<32x32xf32>
    %44 = arith.mulf %40, %43 : vector<32x32xf32>
    %c0_29 = arith.constant 0 : index
    %c0_30 = arith.constant 0 : index
    %c0_31 = arith.constant 0 : index
    %45 = vector.load %arg9[%c0_29, %c0_30, %c0_31] : memref<3x1x32xf32, #tpu.memory_space<vmem>>, vector<1x1x32xf32>
    %46 = vector.shape_cast %45 : vector<1x1x32xf32> to vector<1x32xf32>
    %47 = vector.broadcast %46 : vector<1x32xf32> to vector<32x32xf32>
    %48 = arith.addf %44, %47 : vector<32x32xf32>
    %cst_32 = arith.constant dense<0.000000e+00> : vector<32x32xf32>
    %49 = tpu.matmul %3, %48, %cst_32 {dimension_numbers = #tpu.dot_dimension_numbers<[1], [0], [0], [1], [0, 0, 1, 1], [], []>} : vector<32x32xf32>, vector<32x32xf32>, vector<32x32xf32> -> vector<32x32xf32>
    %c1 = arith.constant 1 : index
    %c0_33 = arith.constant 0 : index
    %c0_34 = arith.constant 0 : index
    %50 = vector.load %arg4[%c1, %c0_33, %c0_34] : memref<3x32x32xf32, #tpu.memory_space<vmem>>, vector<1x32x32xf32>
    %51 = vector.shape_cast %50 : vector<1x32x32xf32> to vector<32x32xf32>
    %cst_35 = arith.constant dense<0.000000e+00> : vector<32x32xf32>
    %52 = tpu.matmul %49, %51, %cst_35 {dimension_numbers = #tpu.dot_dimension_numbers<[1], [0], [0], [1], [0, 0, 1, 1], [], []>} : vector<32x32xf32>, vector<32x32xf32>, vector<32x32xf32> -> vector<32x32xf32>
    %c1_36 = arith.constant 1 : index
    %c0_37 = arith.constant 0 : index
    %c0_38 = arith.constant 0 : index
    %53 = vector.load %arg5[%c1_36, %c0_37, %c0_38] : memref<3x1x32xf32, #tpu.memory_space<vmem>>, vector<1x1x32xf32>
    %54 = vector.shape_cast %53 : vector<1x1x32xf32> to vector<1x32xf32>
    %55 = vector.broadcast %54 : vector<1x32xf32> to vector<32x32xf32>
    %56 = arith.addf %52, %55 : vector<32x32xf32>
    %cst_39 = arith.constant 0.000000e+00 : f32
    %57 = vector.broadcast %cst_39 : f32 to vector<32x32xf32>
    %58 = arith.maximumf %56, %57 : vector<32x32xf32>
    %c1_40 = arith.constant 1 : index
    %c0_41 = arith.constant 0 : index
    %c0_42 = arith.constant 0 : index
    %59 = vector.load %arg6[%c1_40, %c0_41, %c0_42] : memref<3x32x32xf32, #tpu.memory_space<vmem>>, vector<1x32x32xf32>
    %60 = vector.shape_cast %59 : vector<1x32x32xf32> to vector<32x32xf32>
    %cst_43 = arith.constant dense<0.000000e+00> : vector<32x32xf32>
    %61 = tpu.matmul %58, %60, %cst_43 {dimension_numbers = #tpu.dot_dimension_numbers<[1], [0], [0], [1], [0, 0, 1, 1], [], []>} : vector<32x32xf32>, vector<32x32xf32>, vector<32x32xf32> -> vector<32x32xf32>
    %c1_44 = arith.constant 1 : index
    %c0_45 = arith.constant 0 : index
    %c0_46 = arith.constant 0 : index
    %62 = vector.load %arg7[%c1_44, %c0_45, %c0_46] : memref<3x1x32xf32, #tpu.memory_space<vmem>>, vector<1x1x32xf32>
    %63 = vector.shape_cast %62 : vector<1x1x32xf32> to vector<1x32xf32>
    %64 = vector.broadcast %63 : vector<1x32xf32> to vector<32x32xf32>
    %65 = arith.addf %61, %64 : vector<32x32xf32>
    %cst_47 = arith.constant 0.000000e+00 : f32
    %66 = vector.broadcast %cst_47 : f32 to vector<32x32xf32>
    %67 = arith.maximumf %65, %66 : vector<32x32xf32>
    %cst_48 = arith.constant dense<0.000000e+00> : vector<32xf32>
    %68 = vector.multi_reduction <add>, %67, %cst_48 [0] : vector<32x32xf32> to vector<32xf32>
    %69 = vector.shape_cast %68 : vector<32xf32> to vector<1x32xf32>
    %cst_49 = arith.constant 3.200000e+01 : f32
    %70 = vector.broadcast %cst_49 : f32 to vector<1x32xf32>
    %71 = arith.divf %69, %70 : vector<1x32xf32>
    %72 = vector.broadcast %71 : vector<1x32xf32> to vector<32x32xf32>
    %73 = arith.subf %67, %72 : vector<32x32xf32>
    %74 = arith.mulf %73, %73 : vector<32x32xf32>
    %cst_50 = arith.constant dense<0.000000e+00> : vector<32xf32>
    %75 = vector.multi_reduction <add>, %74, %cst_50 [0] : vector<32x32xf32> to vector<32xf32>
    %76 = vector.shape_cast %75 : vector<32xf32> to vector<1x32xf32>
    %cst_51 = arith.constant 3.200000e+01 : f32
    %77 = vector.broadcast %cst_51 : f32 to vector<1x32xf32>
    %78 = arith.divf %76, %77 : vector<1x32xf32>
    %79 = vector.broadcast %71 : vector<1x32xf32> to vector<32x32xf32>
    %80 = arith.subf %67, %79 : vector<32x32xf32>
    %cst_52 = arith.constant 9.99999974E-6 : f32
    %81 = vector.broadcast %cst_52 : f32 to vector<1x32xf32>
    %82 = arith.addf %78, %81 : vector<1x32xf32>
    %83 = math.rsqrt %82 : vector<1x32xf32>
    %84 = vector.broadcast %83 : vector<1x32xf32> to vector<32x32xf32>
    %85 = arith.mulf %80, %84 : vector<32x32xf32>
    %c1_53 = arith.constant 1 : index
    %c0_54 = arith.constant 0 : index
    %c0_55 = arith.constant 0 : index
    %86 = vector.load %arg8[%c1_53, %c0_54, %c0_55] : memref<3x1x32xf32, #tpu.memory_space<vmem>>, vector<1x1x32xf32>
    %87 = vector.shape_cast %86 : vector<1x1x32xf32> to vector<1x32xf32>
    %88 = vector.broadcast %87 : vector<1x32xf32> to vector<32x32xf32>
    %89 = arith.mulf %85, %88 : vector<32x32xf32>
    %c1_56 = arith.constant 1 : index
    %c0_57 = arith.constant 0 : index
    %c0_58 = arith.constant 0 : index
    %90 = vector.load %arg9[%c1_56, %c0_57, %c0_58] : memref<3x1x32xf32, #tpu.memory_space<vmem>>, vector<1x1x32xf32>
    %91 = vector.shape_cast %90 : vector<1x1x32xf32> to vector<1x32xf32>
    %92 = vector.broadcast %91 : vector<1x32xf32> to vector<32x32xf32>
    %93 = arith.addf %89, %92 : vector<32x32xf32>
    %cst_59 = arith.constant dense<0.000000e+00> : vector<32x32xf32>
    %94 = tpu.matmul %3, %93, %cst_59 {dimension_numbers = #tpu.dot_dimension_numbers<[1], [0], [0], [1], [0, 0, 1, 1], [], []>} : vector<32x32xf32>, vector<32x32xf32>, vector<32x32xf32> -> vector<32x32xf32>
    %c2 = arith.constant 2 : index
    %c0_60 = arith.constant 0 : index
    %c0_61 = arith.constant 0 : index
    %95 = vector.load %arg4[%c2, %c0_60, %c0_61] : memref<3x32x32xf32, #tpu.memory_space<vmem>>, vector<1x32x32xf32>
    %96 = vector.shape_cast %95 : vector<1x32x32xf32> to vector<32x32xf32>
    %cst_62 = arith.constant dense<0.000000e+00> : vector<32x32xf32>
    %97 = tpu.matmul %94, %96, %cst_62 {dimension_numbers = #tpu.dot_dimension_numbers<[1], [0], [0], [1], [0, 0, 1, 1], [], []>} : vector<32x32xf32>, vector<32x32xf32>, vector<32x32xf32> -> vector<32x32xf32>
    %c2_63 = arith.constant 2 : index
    %c0_64 = arith.constant 0 : index
    %c0_65 = arith.constant 0 : index
    %98 = vector.load %arg5[%c2_63, %c0_64, %c0_65] : memref<3x1x32xf32, #tpu.memory_space<vmem>>, vector<1x1x32xf32>
    %99 = vector.shape_cast %98 : vector<1x1x32xf32> to vector<1x32xf32>
    %100 = vector.broadcast %99 : vector<1x32xf32> to vector<32x32xf32>
    %101 = arith.addf %97, %100 : vector<32x32xf32>
    %cst_66 = arith.constant 0.000000e+00 : f32
    %102 = vector.broadcast %cst_66 : f32 to vector<32x32xf32>
    %103 = arith.maximumf %101, %102 : vector<32x32xf32>
    %c2_67 = arith.constant 2 : index
    %c0_68 = arith.constant 0 : index
    %c0_69 = arith.constant 0 : index
    %104 = vector.load %arg6[%c2_67, %c0_68, %c0_69] : memref<3x32x32xf32, #tpu.memory_space<vmem>>, vector<1x32x32xf32>
    %105 = vector.shape_cast %104 : vector<1x32x32xf32> to vector<32x32xf32>
    %cst_70 = arith.constant dense<0.000000e+00> : vector<32x32xf32>
    %106 = tpu.matmul %103, %105, %cst_70 {dimension_numbers = #tpu.dot_dimension_numbers<[1], [0], [0], [1], [0, 0, 1, 1], [], []>} : vector<32x32xf32>, vector<32x32xf32>, vector<32x32xf32> -> vector<32x32xf32>
    %c2_71 = arith.constant 2 : index
    %c0_72 = arith.constant 0 : index
    %c0_73 = arith.constant 0 : index
    %107 = vector.load %arg7[%c2_71, %c0_72, %c0_73] : memref<3x1x32xf32, #tpu.memory_space<vmem>>, vector<1x1x32xf32>
    %108 = vector.shape_cast %107 : vector<1x1x32xf32> to vector<1x32xf32>
    %109 = vector.broadcast %108 : vector<1x32xf32> to vector<32x32xf32>
    %110 = arith.addf %106, %109 : vector<32x32xf32>
    %cst_74 = arith.constant 0.000000e+00 : f32
    %111 = vector.broadcast %cst_74 : f32 to vector<32x32xf32>
    %112 = arith.maximumf %110, %111 : vector<32x32xf32>
    %cst_75 = arith.constant dense<0.000000e+00> : vector<32xf32>
    %113 = vector.multi_reduction <add>, %112, %cst_75 [0] : vector<32x32xf32> to vector<32xf32>
    %114 = vector.shape_cast %113 : vector<32xf32> to vector<1x32xf32>
    %cst_76 = arith.constant 3.200000e+01 : f32
    %115 = vector.broadcast %cst_76 : f32 to vector<1x32xf32>
    %116 = arith.divf %114, %115 : vector<1x32xf32>
    %117 = vector.broadcast %116 : vector<1x32xf32> to vector<32x32xf32>
    %118 = arith.subf %112, %117 : vector<32x32xf32>
    %119 = arith.mulf %118, %118 : vector<32x32xf32>
    %cst_77 = arith.constant dense<0.000000e+00> : vector<32xf32>
    %120 = vector.multi_reduction <add>, %119, %cst_77 [0] : vector<32x32xf32> to vector<32xf32>
    %121 = vector.shape_cast %120 : vector<32xf32> to vector<1x32xf32>
    %cst_78 = arith.constant 3.200000e+01 : f32
    %122 = vector.broadcast %cst_78 : f32 to vector<1x32xf32>
    %123 = arith.divf %121, %122 : vector<1x32xf32>
    %124 = vector.broadcast %116 : vector<1x32xf32> to vector<32x32xf32>
    %125 = arith.subf %112, %124 : vector<32x32xf32>
    %cst_79 = arith.constant 9.99999974E-6 : f32
    %126 = vector.broadcast %cst_79 : f32 to vector<1x32xf32>
    %127 = arith.addf %123, %126 : vector<1x32xf32>
    %128 = math.rsqrt %127 : vector<1x32xf32>
    %129 = vector.broadcast %128 : vector<1x32xf32> to vector<32x32xf32>
    %130 = arith.mulf %125, %129 : vector<32x32xf32>
    %c2_80 = arith.constant 2 : index
    %c0_81 = arith.constant 0 : index
    %c0_82 = arith.constant 0 : index
    %131 = vector.load %arg8[%c2_80, %c0_81, %c0_82] : memref<3x1x32xf32, #tpu.memory_space<vmem>>, vector<1x1x32xf32>
    %132 = vector.shape_cast %131 : vector<1x1x32xf32> to vector<1x32xf32>
    %133 = vector.broadcast %132 : vector<1x32xf32> to vector<32x32xf32>
    %134 = arith.mulf %130, %133 : vector<32x32xf32>
    %c2_83 = arith.constant 2 : index
    %c0_84 = arith.constant 0 : index
    %c0_85 = arith.constant 0 : index
    %135 = vector.load %arg9[%c2_83, %c0_84, %c0_85] : memref<3x1x32xf32, #tpu.memory_space<vmem>>, vector<1x1x32xf32>
    %136 = vector.shape_cast %135 : vector<1x1x32xf32> to vector<1x32xf32>
    %137 = vector.broadcast %136 : vector<1x32xf32> to vector<32x32xf32>
    %138 = arith.addf %134, %137 : vector<32x32xf32>
    %cst_86 = arith.constant 0.000000e+00 : f32
    %139 = vector.broadcast %cst_86 : f32 to vector<32x32xf32>
    %140 = tpu.concatenate %48, %93, %138, %139 in 1 : vector<32x32xf32>, vector<32x32xf32>, vector<32x32xf32>, vector<32x32xf32> -> vector<32x128xf32>
    %c0_87 = arith.constant 0 : index
    %c0_88 = arith.constant 0 : index
    %c0_89 = arith.constant 0 : index
    %141 = vector.load %arg3[%c0_87, %c0_88, %c0_89] : memref<1x4x32xf32, #tpu.memory_space<vmem>>, vector<1x4x32xf32>
    %142 = vector.shape_cast %141 : vector<1x4x32xf32> to vector<4x32xf32>
    %cst_90 = arith.constant dense<0.000000e+00> : vector<4x128xf32>
    %143 = tpu.matmul %142, %140, %cst_90 {dimension_numbers = #tpu.dot_dimension_numbers<[1], [0], [0], [1], [0, 0, 1, 1], [], []>} : vector<4x32xf32>, vector<32x128xf32>, vector<4x128xf32> -> vector<4x128xf32>
    %144 = arith.mulf %143, %143 : vector<4x128xf32>
    %cst_91 = arith.constant dense<0.000000e+00> : vector<4xf32>
    %145 = vector.multi_reduction <add>, %144, %cst_91 [1] : vector<4x128xf32> to vector<4xf32>
    %146 = vector.shape_cast %145 : vector<4xf32> to vector<4x1xf32>
    %cst_92 = arith.constant 1.000000e-24 : f32
    %147 = vector.broadcast %cst_92 : f32 to vector<4x1xf32>
    %148 = arith.maximumf %146, %147 : vector<4x1xf32>
    %149 = math.rsqrt %148 : vector<4x1xf32>
    %150 = vector.broadcast %149 : vector<4x1xf32> to vector<4x128xf32>
    %151 = arith.mulf %143, %150 : vector<4x128xf32>
    %c0_93 = arith.constant 0 : index
    %c0_94 = arith.constant 0 : index
    %c0_95 = arith.constant 0 : index
    %152 = vector.load %arg10[%c0_93, %c0_94, %c0_95] : memref<1x4x128xf32, #tpu.memory_space<vmem>>, vector<1x4x128xf32>
    %153 = vector.shape_cast %152 : vector<1x4x128xf32> to vector<4x128xf32>
    %154 = vector.shape_cast %151 : vector<4x128xf32> to vector<1x4x128xf32>
    tpu.vector_store %arg10[%c0_93, %c0_94, %c0_95], %154 {strides = array<i32>} : memref<1x4x128xf32, #tpu.memory_space<vmem>>, vector<1x4x128xf32>,
    return
  }
  func.func @transform_0(%arg0: i32) -> (i32, i32, i32) {
    %c0_i32 = arith.constant 0 : i32
    %c0_i32_0 = arith.constant 0 : i32
    %c0_i32_1 = arith.constant 0 : i32
    return %arg0, %c0_i32, %c0_i32_0 : i32, i32, i32
  }
  func.func @transform_1(%arg0: i32) -> (i32, i32, i32) {
    %c0_i32 = arith.constant 0 : i32
    %c0_i32_0 = arith.constant 0 : i32
    %c0_i32_1 = arith.constant 0 : i32
    return %arg0, %c0_i32, %c0_i32_0 : i32, i32, i32
  }
  func.func @transform_2(%arg0: i32) -> (i32, i32, i32) {
    %c0_i32 = arith.constant 0 : i32
    %c0_i32_0 = arith.constant 0 : i32
    %c0_i32_1 = arith.constant 0 : i32
    return %arg0, %c0_i32, %c0_i32_0 : i32, i32, i32
  }
  func.func @transform_3(%arg0: i32) -> (i32, i32, i32) {
    %c0_i32 = arith.constant 0 : i32
    %c0_i32_0 = arith.constant 0 : i32
    %c0_i32_1 = arith.constant 0 : i32
    %c0_i32_2 = arith.constant 0 : i32
    return %c0_i32, %c0_i32_0, %c0_i32_1 : i32, i32, i32
  }
  func.func @transform_4(%arg0: i32) -> (i32, i32, i32) {
    %c0_i32 = arith.constant 0 : i32
    %c0_i32_0 = arith.constant 0 : i32
    %c0_i32_1 = arith.constant 0 : i32
    %c0_i32_2 = arith.constant 0 : i32
    return %c0_i32, %c0_i32_0, %c0_i32_1 : i32, i32, i32
  }
  func.func @transform_5(%arg0: i32) -> (i32, i32, i32) {
    %c0_i32 = arith.constant 0 : i32
    %c0_i32_0 = arith.constant 0 : i32
    %c0_i32_1 = arith.constant 0 : i32
    %c0_i32_2 = arith.constant 0 : i32
    return %c0_i32, %c0_i32_0, %c0_i32_1 : i32, i32, i32
  }
  func.func @transform_6(%arg0: i32) -> (i32, i32, i32) {
    %c0_i32 = arith.constant 0 : i32
    %c0_i32_0 = arith.constant 0 : i32
    %c0_i32_1 = arith.constant 0 : i32
    %c0_i32_2 = arith.constant 0 : i32
    return %c0_i32, %c0_i32_0, %c0_i32_1 : i32, i32, i32
  }
  func.func @transform_7(%arg0: i32) -> (i32, i32, i32) {
    %c0_i32 = arith.constant 0 : i32
    %c0_i32_0 = arith.constant 0 : i32
    %c0_i32_1 = arith.constant 0 : i32
    %c0_i32_2 = arith.constant 0 : i32
    return %c0_i32, %c0_i32_0, %c0_i32_1 : i32, i32, i32
  }
  func.func @transform_8(%arg0: i32) -> (i32, i32, i32) {
    %c0_i32 = arith.constant 0 : i32
    %c0_i32_0 = arith.constant 0 : i32
    %c0_i32_1 = arith.constant 0 : i32
    %c0_i32_2 = arith.constant 0 : i32
    return %c0_i32, %c0_i32_0, %c0_i32_1 : i32, i32, i32
  }
  func.func @transform_9(%arg0: i32) -> (i32, i32, i32) {
    %c0_i32 = arith.constant 0 : i32
    %c0_i32_0 = arith.constant 0 : i32
    %c0_i32_1 = arith.constant 0 : i32
    return %arg0, %c0_i32, %c0_i32_0 : i32, i32, i32
  }
}

</mosaic_0001>

<bundles_post_ra>
// kernel: tpu_custom_call.1
= control target key start
LH: loop header
LB: loop body
LE: loop exit
PB: predicated region body
PF: predicated region fallthrough
CT: control target
= control target key end

     0   :  { %s2986_s0 = inlined_call_operand.hbm [shape: f32[8,32,32], index: 0, kind: input, shape index: {}]   ;;  %s2987_s1 = inlined_call_operand.hbm [shape: f32[8,32,32], index: 1, kind: input, shape index: {}]   ;;  %s2988_s2 = inlined_call_operand.hbm [shape: f32[8,4,32], index: 2, kind: input, shape index: {}]   ;;  %s2989_s3 = inlined_call_operand.hbm [shape: f32[3,32,32], index: 3, kind: input, shape index: {}]   ;;  %s2990_s4 = inlined_call_operand.vmem [shape: f32[3,1,32], index: 4, kind: input, shape index: {}]   ;;  %s2991_s5 = inlined_call_operand.hbm [shape: f32[3,32,32], index: 5, kind: input, shape index: {}]   ;;  %s2992_s6 = inlined_call_operand.vmem [shape: f32[3,1,32], index: 6, kind: input, shape index: {}]   ;;  %s2993_s7 = inlined_call_operand.vmem [shape: f32[3,1,32], index: 7, kind: input, shape index: {}]   ;;  %s2994_s8 = inlined_call_operand.vmem [shape: f32[3,1,32], index: 8, kind: input, shape index: {}]   ;;  %s2995_s9 = inlined_call_operand.hbm [shape: f32[8,4,128], index: 9, kind: output, shape index: {}]  }
   0x1   :  { %3016 = sst [smem:[#allocation22_spill]] %s2986_s0 }
   0x2   :  { %3017 = sst [smem:[#allocation23_spill]] %s2987_s1 }
   0x3   :  { %3018 = sst [smem:[#allocation24_spill]] %s2989_s3 }
   0x4   :  { %3019 = sst [smem:[#allocation25_spill]] %s2991_s5 }
   0x5   :  { %3020 = sst [smem:[#allocation26_spill]] %s2995_s9 }
   0x6   :  { %14 = vsyncpa [#allocation3], 0 }
   0x7   :  { %16 = vsyncpa [#allocation3 + $0x1], 0 }
   0x8   :  { %17 = vsyncpa [#allocation6], 0 }
   0x9   :  { %19 = vsyncpa [#allocation6 + $0x1], 0 }
   0xa   :  { %20 = vsyncpa [#allocation9], 0 }
   0xb   :  { %21 = vsyncpa [#allocation4], 0 }
   0xc   :  { %23 = vsyncpa [#allocation4 + $0x1], 0  ;;  %s2546_s30 = smov 0   ;;  %s2548_s10 = smov 0  }
   0xd   :  { %s2550_s11 = smov 0   ;;  %s2552_s12 = smov 0  }
   0xe LB: > { %3021 = sst [smem:[#allocation16_spill]] %s2470_s30  ;;  %s2567_s13 = sadd.s32 4294967295, %s2482_s12   ;;  %s2482_s12 = sphi %s2552_s12, %s3056_s12   ;;  %s2478_s11 = sphi %s2550_s11, %s3058_s11   ;;  %s2474_s10 = sphi %s2548_s10, %s3060_s10   ;;  %s2470_s30 = sphi %s2546_s30, %s3059_s30  }
   0xf   : > { %3022 = sst [smem:[#allocation17_spill]] %s2478_s11  ;;  %s1882_s14 = sadd.s32 4294967294, %s2482_s12  }
  0x10   : > { %s2571_s15 = sadd.s32 1, %s2482_s12   ;;  %s36_s16 = sadd.s32 1, %s2478_s11 }
  0x11   : > { %3023 = sst [smem:[#allocation18_spill]] %s2571_s15  ;;  %s33_s17 = ssub.s32 %s2482_s12, %s2571_s15 }
  0x12   : > { %p43_p0 = scmp.ne.s32.totalorder %s2478_s11, %s2474_s10  ;;  %p34_p1 = scmp.eq.s32.totalorder %s33_s17, 0 }
  0x13   : > { %p44_p2 = scmp.eq.s32.totalorder %s2482_s12, 0  ;;  %p49_p3 = scmp.ne.s32.totalorder %s2474_s10, %s2470_s30 }
  0x14   : > { %p2996_p4 = scmp.eq.s32.totalorder %s2567_s13, 0  ;;  %p251_p7 = scmp.eq.s32.totalorder %s2567_s13, 7 }
  0x15   : > { %s2583_s18 = scalar_select %p34_p1, %s2478_s11, %s36_s16  }
  0x16   : > { %p2585_p5 = por %p44_p2, %p43_p0  ;;  %p2591_p6 = por %p2996_p4, %p49_p3 }
  0x17   : > { %3024 = sst [smem:[#allocation19_spill]] %s2583_s18  ;;  %p257_p8 = scmp.eq.s32.totalorder %s1882_s14, 7 }
  0x18   : > { %s3026_s20 = scalar_select %p2591_p6, 1, 0 }
  0x19   : > { %p1883_p9 = scmp.ge.s32.totalorder %s2482_s12, 1  ;;  %p264_p10 = scmp.lt.s32.totalorder %s2482_s12, 9 }
  0x1a   : > { %p2598_p11 = por %p251_p7, %p43_p0  ;;  %p2602_p12 = por %p257_p8, %p49_p3 }
  0x1b   : > { %p2606_p13 = pnand %p1883_p9, %p264_p10  ;;  %s2484_s24 = smov [#allocation8]  }
  0x1c   : > { %s3027_s21 = scalar_select %p2598_p11, 1, 0 }
  0x1d   : > { %s3029_s22 = scalar_select %p2602_p12, 1, 0 }
  0x1e   : > { %3028 = sst [smem:[#allocation20_spill]] %s3027_s21  ;;  %p2199_p1 = pneg %p2606_p13 }
  0x1f   : > { %3030 = sst [smem:[#allocation21_spill]] %s3029_s22  ;;  %s276_s25 = sshll.u32 %s2484_s24, 4  ;;  %s277_s25 = int_to_ptr.vmem [resolvable:$true] %s276_s25 }
  0x20   : > { %s3031_s23 = scalar_select %p2606_p13, 1, 0 }
  0x21   : > { %p2614_p2 = pnand %p2199_p1, %p2996_p4  ;;  %p2222_p0 = scmp.lt.s32.totalorder %s2482_s12, 8 }
  0x22   : > { %s2620_s27 = sand.u32 1, %s2478_s11   ;;  %s2285_s29 = scalar_lea.vmem %s277_s25, 1536 }
  0x23   : > { %s3032_s26 = scalar_select %p2614_p2, 1, 0 }
  0x24   : > { %p3005_p3 = pneg %p2614_p2  ;;  %p2286_p7 = scmp.ne.s32.totalorder %s277_s25, %s2285_s29 }
  0x25   : > { %p2293_p10 = scmp.lt.s32.totalorder %s277_s25, %s277_s25  ;;  %p2294_p1 = scmp.lt.s32.totalorder %s2285_s29, %s2285_s29 }
  0x26   : > { %p2288_p8 = pnand %p2286_p7, %p3005_p3 }
  0x27   : > { %p2295_p4 = por %p2294_p1, %p2293_p10 }
  0x28   : > { %p2289_p9 = pneg %p2288_p8 }
  0x2a   : > { %p2296_p12 = pnand %p2295_p4, %p2289_p9 }
  0x2c   : > { %2299 = shalt.err (!%p2296_p12)
}
  0x2d   : > { %s3002_s14 = smov 128   ;;  %s3006_s16 = smov 8  }
  0x2e   : > { %s3033_s3 = sld [smem:[#allocation24_spill]]  ;;  %s3004_s29 = sshll.u32 %s2482_s12, 9 }
  0x2f   : > { %p2641_p4 = pnand %p2222_p0, %p2585_p5  ;;  %s336_s18 = sand.u32 1, %s2482_s12  }
  0x30   : > { %s3035_s1 = sld [smem:[#allocation23_spill]]  ;;  %s3036_s30 = sshll.u32 %s2620_s27, 5 }
  0x31   : > { %s2657_s19 = scalar_lea.sflag [#allocation6], %s336_s18  ;;  %p2663_p12 = pneg %p2641_p4 }
  0x34   : > { %2202 = dma.hbm_to_vmem [thread:$0]  (!%p2614_p2), %s3033_s3, 1536, %s277_s25, [#allocation9], %s3002_s14, %s3002_s14, %s3006_s16  }
  0x35   : > { %s340_s25 = scalar_lea.vmem [#allocation5], %s3036_s30 }
  0x36   : > { %s2651_s22 = scalar_lea.hbm %s3035_s1, %s3004_s29  ;;  %s347_s17 = sshll.u32 %s340_s25, 4  ;;  %s2655_s17 = int_to_ptr.vmem [resolvable:$true] %s347_s17 }
  0x37   : > { %s2300_s24 = scalar_lea.hbm %s2651_s22, 512  ;;  %s2305_s30 = scalar_lea.hbm %s3035_s1, 4096 }
  0x38   : > { %p2301_p5 = scmp.ne.s32.totalorder %s2651_s22, %s2300_s24  ;;  %p2306_p8 = scmp.lt.s32.totalorder %s2651_s22, %s3035_s1 }
  0x39   : > { %p2307_p9 = scmp.lt.s32.totalorder %s2305_s30, %s2300_s24 }
  0x3a   : > { %p2303_p0 = pnand %p2663_p12, %p2301_p5 }
  0x3b   : > { %p2308_p10 = por %p2307_p9, %p2306_p8 }
  0x3c   : > { %p2304_p7 = pneg %p2303_p0 }
  0x3e   : > { %p2309_p1 = pnand %p2308_p10, %p2304_p7 }
  0x40   : > { %2312 = shalt.err (!%p2309_p1)
}
  0x41   : > { %s2313_s18 = scalar_lea.vmem %s2655_s17, 512  ;;  %s2487_s16 = smov [#allocation5]  }
  0x42   : > { %p2314_p3 = scmp.ne.s32.totalorder %s2655_s17, %s2313_s18  ;;  %s2318_s11 = sshll.u32 %s2487_s16, 4  ;;  %s2319_s11 = int_to_ptr.vmem [resolvable:$false] %s2318_s11 }
  0x43   : > { %s2320_s15 = scalar_lea.vmem %s2319_s11, 1024  ;;  %p2321_p11 = scmp.lt.s32.totalorder %s2655_s17, %s2319_s11 }
  0x44   : > { %p2316_p5 = pnand %p2314_p3, %p2663_p12  ;;  %p2322_p6 = scmp.lt.s32.totalorder %s2320_s15, %s2313_s18 }
  0x46   : > { %p2317_p0 = pneg %p2316_p5  ;;  %p2323_p13 = por %p2322_p6, %p2321_p11 }
  0x48   : > { %p2324_p2 = pnand %p2323_p13, %p2317_p0 }
  0x4a   : > { %2327 = shalt.err (!%p2324_p2)
}
  0x4b   : > { %s3038_s29 = smov 8   ;;  %s3039_s24 = smov 128  }
  0x4c   : > { %2212 = dma.hbm_to_vmem [thread:$0]  (!%p2641_p4), %s2651_s22, 512, %s2655_s17, %s2657_s19, %s3039_s24, %s3039_s24, %s3038_s29  }
  0x4d   : > { %s2488_s30 = smov [#allocation10]   ;;  %p3040_p7 = scmp.ne.s32.totalorder %s3032_s26, 0 }
  0x4e   : > { %s292_s25 = sshll.u32 %s2488_s30, 4  ;;  %s293_s25 = int_to_ptr.vmem [resolvable:$true] %s292_s25 }
  0x4f   : > { %s2339_s16 = scalar_lea.vmem %s293_s25, 1536  ;;  %p3041_p8 = pneg %p3040_p7 }
  0x50   : > { %p2340_p3 = scmp.ne.s32.totalorder %s293_s25, %s2339_s16  ;;  %p2347_p13 = scmp.lt.s32.totalorder %s293_s25, %s293_s25 }
  0x51   : > { %p2348_p2 = scmp.lt.s32.totalorder %s2339_s16, %s2339_s16 }
  0x52   : > { %p2342_p6 = pnand %p2340_p3, %p3041_p8 }
  0x53   : > { %p2349_p9 = por %p2348_p2, %p2347_p13 }
  0x54   : > { %p2343_p11 = pneg %p2342_p6 }
  0x56   : > { %p2350_p10 = pnand %p2349_p9, %p2343_p11 }
  0x58   : > { %2353 = shalt.err (!%p2350_p10)
}
  0x59   : > { %s3042_s5 = sld [smem:[#allocation25_spill]]  ;;  %s3043_s18 = sshll.u32 %s2482_s12, 9 }
  0x5a   : > { %s3044_s0 = sld [smem:[#allocation22_spill]]  ;;  %s3045_s16 = sshll.u32 %s2620_s27, 5 }
  0x5b   : > { %s319_s26 = scalar_lea.vmem [#allocation2], %s3045_s16  ;;  %s1893_s22 = sshll.u32 %s2620_s27, 2 }
  0x5c   : > { %s326_s1 = sshll.u32 %s319_s26, 4  ;;  %s316_s17 = scalar_lea.sflag [#allocation3], %s2620_s27  ;;  %s2709_s1 = int_to_ptr.vmem [resolvable:$true] %s326_s1 }
  0x5f   : > { %2205 = dma.hbm_to_vmem [thread:$0]  (!%p3040_p7), %s3042_s5, 1536, %s293_s25, [#allocation9], %s3039_s24, %s3039_s24, %s3038_s29  }
  0x60   : > { %s2705_s30 = scalar_lea.hbm %s3044_s0, %s3043_s18  ;;  %s2359_s18 = scalar_lea.hbm %s3044_s0, 4096 }
  0x61   : > { %s2354_s3 = scalar_lea.hbm %s2705_s30, 512  ;;  %p2360_p3 = scmp.lt.s32.totalorder %s2705_s30, %s3044_s0 }
  0x62   : > { %p2355_p1 = scmp.ne.s32.totalorder %s2705_s30, %s2354_s3  ;;  %p2361_p7 = scmp.lt.s32.totalorder %s2359_s18, %s2354_s3 }
  0x64   : > { %p2357_p5 = pnand %p2355_p1, %p2663_p12  ;;  %p2362_p8 = por %p2361_p7, %p2360_p3 }
  0x66   : > { %p2358_p0 = pneg %p2357_p5 }
  0x68   : > { %p2363_p6 = pnand %p2362_p8, %p2358_p0 }
  0x6a   : > { %2366 = shalt.err (!%p2363_p6)
}
  0x6b   : > { %s2367_s16 = scalar_lea.vmem %s2709_s1, 512  ;;  %s2489_s26 = smov [#allocation2]  }
  0x6c   : > { %p2368_p11 = scmp.ne.s32.totalorder %s2709_s1, %s2367_s16  ;;  %s2372_s5 = sshll.u32 %s2489_s26, 4  ;;  %s2373_s5 = int_to_ptr.vmem [resolvable:$false] %s2372_s5 }
  0x6d   : > { %s2374_s25 = scalar_lea.vmem %s2373_s5, 1024  ;;  %p2375_p9 = scmp.lt.s32.totalorder %s2709_s1, %s2373_s5 }
  0x6e   : > { %p2370_p13 = pnand %p2368_p11, %p2663_p12  ;;  %p2376_p10 = scmp.lt.s32.totalorder %s2374_s25, %s2367_s16 }
  0x70   : > { %p2371_p2 = pneg %p2370_p13  ;;  %p2377_p1 = por %p2376_p10, %p2375_p9 }
  0x72   : > { %p2378_p5 = pnand %p2377_p1, %p2371_p2 }
  0x74   : > { %2381 = shalt.err (!%p2378_p5)
}
  0x75   : > { %2209 = dma.hbm_to_vmem [thread:$0]  (!%p2641_p4), %s2705_s30, 512, %s2709_s1, %s316_s17, %s3039_s24, %s3039_s24, %s3038_s29  }
  0x76   : > { %s1894_s3 = sshll.u32 %s2482_s12, 6  ;;  %s361_s16 = scalar_lea.vmem [#allocation7], %s1893_s22 }
  0x77   : > { %s366_s15 = scalar_lea.hbm %s2988_s2, %s1894_s3  ;;  %s368_s26 = sshll.u32 %s361_s16, 4  ;;  %s369_s26 = int_to_ptr.vmem [resolvable:$true] %s368_s26 }
  0x78   : > { %s2382_s5 = scalar_lea.hbm %s366_s15, 64  ;;  %s2387_s9 = scalar_lea.hbm %s2988_s2, 512 }
  0x79   : > { %p2383_p0 = scmp.ne.s32.totalorder %s366_s15, %s2382_s5  ;;  %p2388_p8 = scmp.lt.s32.totalorder %s366_s15, %s2988_s2 }
  0x7a   : > { %p2389_p6 = scmp.lt.s32.totalorder %s2387_s9, %s2382_s5 }
  0x7b   : > { %p2385_p3 = pnand %p2383_p0, %p2663_p12 }
  0x7c   : > { %p2390_p11 = por %p2389_p6, %p2388_p8 }
  0x7d   : > { %p2386_p7 = pneg %p2385_p3 }
  0x7f   : > { %p2391_p13 = pnand %p2390_p11, %p2386_p7 }
  0x81   : > { %2394 = shalt.err (!%p2391_p13)
}
  0x82   : > { %s2395_s27 = scalar_lea.vmem %s369_s26, 64  ;;  %s2490_s29 = smov [#allocation7]  }
  0x83   : > { %p2396_p2 = scmp.ne.s32.totalorder %s369_s26, %s2395_s27  ;;  %s2400_s24 = sshll.u32 %s2490_s29, 4  ;;  %s2401_s24 = int_to_ptr.vmem [resolvable:$false] %s2400_s24 }
  0x84   : > { %s2402_s30 = scalar_lea.vmem %s2401_s24, 128  ;;  %p2403_p1 = scmp.lt.s32.totalorder %s369_s26, %s2401_s24 }
  0x85   : > { %p2398_p9 = pnand %p2396_p2, %p2663_p12  ;;  %p2404_p5 = scmp.lt.s32.totalorder %s2402_s30, %s2395_s27 }
  0x87   : > { %p2399_p10 = pneg %p2398_p9  ;;  %p2405_p0 = por %p2404_p5, %p2403_p1 }
  0x89   : > { %p2406_p3 = pnand %p2405_p0, %p2399_p10 }
  0x8b   : > { %2409 = shalt.err (!%p2406_p3)
}
  0x8c   : > { %2215 = dma.hbm_to_vmem [thread:$0]  (!%p2641_p4), %s366_s15, 64, %s369_s26, %s2657_s19  }
  0x8d   : > { %p3046_p7 = scmp.ne.s32.totalorder %s3031_s23, 0 }
  0x8e   : > { %s2758_s0 = sand.u32 (!%p3046_p7), 1, %s2474_s10   ;;  %p3047_p12 = scmp.ne.s32.totalorder (!%p3046_p7), %s3026_s20, 0 }
  0x8f   : > { %377 = sbr.rel (%p3046_p7) target bundleno = 2666 (0xa6a), region = 56  ;;  %s1896_s9 = sshll.u32 (!%p3046_p7), %s2758_s0, 5 }
  0x90   : > { %s380_s21 = scalar_lea.sflag (!%p3046_p7), [#allocation3], %s2758_s0  ;;  %s383_s14 = scalar_lea.vmem (!%p3046_p7), [#allocation2], %s1896_s9 }
  0x94   : > { %2453 = dma.done.wait (%p3047_p12), %s380_s21, 512  }
  0x95   : > { %2455 = vsyncadd (%p3047_p12), %s380_s21, 4294966784  ;;  %s388_s28 = sand.u32 1, %s2567_s13   ;;  %s2767_s23 = scalar_lea.vmem [#allocation5], %s1896_s9 }
  0x96   : > { %s389_s19 = scalar_lea.sflag [#allocation6], %s388_s28 }
  0x97   : > { %2457 = dma.done.wait (%p3047_p12), %s389_s19, 576  }
  0x98   : > { %2459 = vsyncadd (%p3047_p12), %s389_s19, 4294966720  ;;  %s1898_s22 = sshll.u32 %s2758_s0, 2  ;;  %p3048_p4 = scmp.eq.s32.totalorder %s2567_s13, 0 }
  0x99   : > { %s2776_s17 = scalar_lea.vmem [#allocation7], %s1898_s22 }
  0x9a   : > { %2461 = dma.done.wait (%p3048_p4), [#allocation9], 3072   ;;  %p3049_p8 = pmov %p3048_p4 }
  0x9b   : > { %vm462_vm0 = vcmask 261120   ;;  %v457_v0 = vld [vmem:[%s383_s14 + $0x18] sm:$0xff]  ;;  %v456_v1 = vld [vmem:[%s383_s14 + $0x10] sm:$0xff]  ;;  %v2783_v2 = vld [vmem:[%s2767_s23] sm:$0xff]  ;;  %vm2493_vm1 = vmmov 0   ;;  %s2494_s16 = smov 64  }
  0x9c   : > { %2463 = vsyncadd (%p3049_p8), [#allocation9], 4294964224  ;;  %2046 = vmatprep.subr.mxu0 %v457_v0  ;;  %v455_v3 = vld [vmem:[%s383_s14 + $0x8] sm:$0xff]  ;;  %2054 = vmatprep.mubr.msk.f32.mxu0 %vm462_vm0, %v2783_v2  ;;  %v563_v4 = vld [vmem:[#allocation8 + $0x18] sm:$0xff]  ;;  %vm1643_vm2 = vcmask 523264   ;;  %vm1648_vm3 = vcmask 785408  }
  0x9d   : > { %2047 = vmatpush3.msra.mxu0 %v457_v0  ;;  %2060 = vmatprep.subr.mxu1 %v563_v4  ;;  %v562_v5 = vld [vmem:[#allocation8 + $0x10] sm:$0xff]  ;;  %v454_v6 = vld [vmem:[%s383_s14] sm:$0xff]  ;;  %v2788_v7 = vld [vmem:[%s2767_s23 + $0x8] sm:$0xff]  ;;  %s2491_s14 = smov 32   ;;  %vm1728_vm4 = vcmask 1043456   ;;  %s3050_s26 = sld [smem:[#allocation20_spill]] }
  0x9e   : > { %2048 = vmatprep.subr.mxu0 %v456_v1  ;;  %2061 = vmatpush3.msra.mxu1 %v563_v4  ;;  %v2791_v8 = vld [vmem:[%s2767_s23 + $0x10] sm:$0xff]  ;;  %v2798_v9 = vld [vmem:[%s2767_s23 + $0x18] sm:$0xff]  ;;  %v560_v11 = vld [vmem:[#allocation8] sm:$0xff]  ;;  %s1964_s5 = sshll.u32 %s2567_s13, 6  ;;  %s3051_s29 = sld [smem:[#allocation26_spill]] }
  0x9f   : > { %2049 = vmatpush3.msra.mxu0 %v456_v1  ;;  %2062 = vmatprep.subr.mxu1 %v562_v5  ;;  %v561_v10 = vld [vmem:[#allocation8 + $0x8] sm:$0xff]  ;;  %v675_v16 = vld [vmem:[#allocation10 + $0x18] sm:$0xff]  ;;  %v674_v17 = vld [vmem:[#allocation10 + $0x10] sm:$0xff]  ;;  %s1737_s30 = scalar_lea.sflag [#allocation4], %s2758_s0  ;;  %s2495_s21 = smov [#allocation11]  }
  0xa0   : > { %2050 = vmatprep.subr.mxu0 %v455_v3  ;;  %2063 = vmatpush3.msra.mxu1 %v562_v5  ;;  %v673_v18 = vld [vmem:[#allocation10 + $0x8] sm:$0xff]  ;;  %v672_v19 = vld [vmem:[#allocation10] sm:$0xff]  ;;  %v1906_v20 = vld [vmem:[%s2990_s4] ss:$0 sm:$0xff] }
  0xa1   : > { %2051 = vmatpush3.msra.mxu0 %v455_v3  ;;  %2064 = vmatprep.subr.mxu1 %v561_v10  ;;  %v938_v33 = vld [vmem:[#allocation8 + $0x38] sm:$0xff]  ;;  %v937_v34 = vld [vmem:[#allocation8 + $0x30] sm:$0xff] }
  0xa2   : > { %2052 = vmatprep.subr.mxu0 %v454_v6  ;;  %2065 = vmatpush3.msra.mxu1 %v561_v10  ;;  %v1911_v35 = vld [vmem:[%s2992_s6] ss:$0 sm:$0xff] }
  0xa3   : > { %2053 = vmatpush3.msra.mxu0 %v454_v6  ;;  %2066 = vmatprep.subr.mxu1 %v560_v11  ;;  %p3052_p11 = scmp.ne.s32.totalorder %s3050_s26, 0 }
  0xa4   : > { %2055 = vmatmul.mubr.msk.f32.vlgmr.msra.gmra.mxu0 %vm462_vm0, %v2788_v7  ;;  %2067 = vmatpush3.msra.mxu1 %v560_v11  ;;  %s1748_s24 = scalar_lea.hbm %s3051_s29, %s1964_s5 }
  0xa5   : > { %2057 = vmatprep.mubr.msk.f32.mxu0 %vm462_vm0, %v2791_v8  ;;  %2074 = vmatprep.subr.mxu0 %v675_v16 }
  0xa6   : > { %2075 = vmatpush3.msra.mxu0 %v675_v16 }
  0xa7   : > { %2076 = vmatprep.subr.mxu0 %v674_v17 }
  0xa8   : > { %2058 = vmatmul.mubr.msk.f32.gmra.mxu0 %vm462_vm0, %v2798_v9 }
  0xa9   : > { %2077 = vmatpush3.msra.mxu0 %v674_v17 }
  0xaa   : > { %2078 = vmatprep.subr.mxu0 %v673_v18 }
  0xab   : > { %2079 = vmatpush3.msra.mxu0 %v673_v18 }
  0xac   : > { %2080 = vmatprep.subr.mxu0 %v672_v19 }
  0xad   : > { %2081 = vmatpush3.msra.mxu0 %v672_v19 }
  0xae   : > { %2102 = vmatprep.subr.mxu0 %v938_v33 }
 0x164   : > { %v2056_v12 = vpop.f32.mrf.mxu0 }
 0x166   : > { %v541_v13 = vpop.f32.mrf.mxu0 }
 0x167   : > { %2068 = vmatprep.mubr.msk.f32.mxu1 %vm462_vm0, %v541_v13 }
 0x168   : > { %v2059_v14 = vpop.f32.mrf.mxu0  ;;  %2069 = vmatmul.mubr.msk.f32.vlgmr.msra.gmra.mxu1 %vm462_vm0, %v2056_v12 }
 0x16a   : > { %v551_v15 = vpop.f32.mrf.mxu0 }
 0x16b   : > { %2071 = vmatprep.mubr.msk.f32.mxu1 %vm462_vm0, %v551_v15 }
 0x16c   : > { %2072 = vmatmul.mubr.msk.f32.gmra.mxu1 %vm462_vm0, %v2059_v14 }
 0x16d   : > { %2096 = vmatprep.mubr.msk.f32.mxu1 %vm462_vm0, %v2783_v2 }
 0x228   : > { %v2070_v21 = vpop.f32.mrf.mxu1 }
 0x229   : > { %v655_v22 = vadd.f32 %v2070_v21, %v1906_v20 }
 0x22a   : > { %v649_v23 = vpop.f32.mrf.mxu1 }
 0x22b   : > { %v650_v24 = vadd.f32 %v1906_v20, %v649_v23  ;;  %v669_v27 = vmax.f32 %v655_v22, 0.0 }
 0x22c   : > { %v2073_v25 = vpop.f32.mrf.mxu1 }
 0x22d   : > { %v668_v26 = vmax.f32 %v650_v24, 0.0  ;;  %v665_v28 = vadd.f32 %v2073_v25, %v1906_v20 }
 0x22e   : > { %v659_v29 = vpop.f32.mrf.mxu1 }
 0x22f   : > { %v660_v30 = vadd.f32 %v1906_v20, %v659_v29  ;;  %2082 = vmatprep.mubr.msk.f32.mxu0 %vm462_vm0, %v668_v26  ;;  %v671_v32 = vmax.f32 %v665_v28, 0.0  ;;  %v1916_v26 = vld [vmem:[%s2993_s7] ss:$0 sm:$0xff] }
 0x230   : > { %2083 = vmatmul.mubr.msk.f32.vlgmr.msra.gmra.mxu0 %vm462_vm0, %v669_v27 }
 0x231   : > { %v670_v31 = vmax.f32 %v660_v30, 0.0  ;;  %2103 = vmatpush3.msra.mxu0 %v938_v33  ;;  %v1917_v30 = vld [vmem:[%s2994_s8] ss:$0 sm:$0xff] }
 0x232   : > { %2104 = vmatprep.subr.mxu0 %v937_v34 }
 0x233   : > { %2085 = vmatprep.mubr.msk.f32.mxu0 %vm462_vm0, %v670_v31  ;;  %2105 = vmatpush3.msra.mxu0 %v937_v34 }
 0x234   : > { %2086 = vmatmul.mubr.msk.f32.gmra.mxu0 %vm462_vm0, %v671_v32 }
 0x2f0   : > { %v2084_v36 = vpop.f32.mrf.mxu0 }
 0x2f1   : > { %v767_v37 = vadd.f32 %v2084_v36, %v1911_v35 }
 0x2f2   : > { %v761_v38 = vpop.f32.mrf.mxu0 }
 0x2f3   : > { %v762_v39 = vadd.f32 %v1911_v35, %v761_v38  ;;  %v781_v41 = vmax.f32 %v767_v37, 0.0 }
 0x2f4   : > { %v2087_v40 = vpop.f32.mrf.mxu0 }
 0x2f5   : > { %v780_v42 = vmax.f32 %v762_v39, 0.0  ;;  %v777_v43 = vadd.f32 %v2087_v40, %v1911_v35  ;;  %v785_v47 = vsel %vm462_vm0, %v781_v41, 0.0  ;;  %v936_v40 = vld [vmem:[#allocation8 + $0x28] sm:$0xff] }
 0x2f6   : > { %v771_v44 = vpop.f32.mrf.mxu0  ;;  %2106 = vmatprep.subr.mxu0 %v936_v40 }
 0x2f7   : > { %v784_v45 = vsel %vm462_vm0, %v780_v42, 0.0  ;;  %v772_v46 = vadd.f32 %v1911_v35, %v771_v44  ;;  %v783_v48 = vmax.f32 %v777_v43, 0.0  ;;  %2107 = vmatpush3.msra.mxu0 %v936_v40 }
 0x2f8   : > { %v786_v50 = vadd.f32 %v785_v47, %v784_v45  ;;  %v1051_v47 = vld [vmem:[#allocation10 + $0x30] sm:$0xff] }
 0x2f9   : > { %v782_v49 = vmax.f32 %v772_v46, 0.0  ;;  %v789_v53 = vsel %vm462_vm0, %v783_v48, 0.0  ;;  %v1052_v46 = vld [vmem:[#allocation10 + $0x38] sm:$0xff] }
 0x2fb   : > { %v787_v51 = vsel %vm462_vm0, %v782_v49, 0.0 }
 0x2fc   : > { %v788_v52 = vadd.f32 %v787_v51, %v786_v50  ;;  %v1923_v50 = vld [vmem:[%s2990_s4 + $0x1] ss:$0 sm:$0xff] }
 0x2fe   : > { %v790_v54 = vadd.f32 %v789_v53, %v788_v52 }
 0x300   : > { %v791_v55 = vrot.slane %v790_v54, 4 }
 0x302   : > { %v792_v56 = vadd.f32 %v791_v55, %v790_v54 }
 0x304   : > { %v793_v57 = vrot.slane %v792_v56, 2 }
 0x306   : > { %v794_v58 = vadd.f32 %v793_v57, %v792_v56 }
 0x308   : > { %v795_v59 = vrot.slane %v794_v58, 1 }
 0x30a   : > { %v796_v60 = vadd.f32 %v795_v59, %v794_v58 }
 0x30c   : > { %v798_v61 = vmul.f32 0.03125, %v796_v60 }
 0x30e   : > { %v799_v62 = vsub.f32 %v780_v42, %v798_v61  ;;  %v800_v63 = vsub.f32 %v781_v41, %v798_v61  ;;  %v801_v0 = vsub.f32 %v782_v49, %v798_v61  ;;  %v802_v1 = vsub.f32 %v783_v48, %v798_v61  ;;  %v935_v41 = vld [vmem:[#allocation8 + $0x20] sm:$0xff]  ;;  %v1050_v48 = vld [vmem:[#allocation10 + $0x28] sm:$0xff] }
 0x30f   : > { %2108 = vmatprep.subr.mxu0 %v935_v41  ;;  %v1049_v49 = vld [vmem:[#allocation10 + $0x20] sm:$0xff] }
 0x310   : > { %v803_v3 = vmul.f32 %v799_v62, %v799_v62  ;;  %v804_v4 = vmul.f32 %v800_v63, %v800_v63  ;;  %v805_v5 = vmul.f32 %v801_v0, %v801_v0  ;;  %v806_v6 = vmul.f32 %v802_v1, %v802_v1  ;;  %2109 = vmatpush3.msra.mxu0 %v935_v41 }
 0x312   : > { %v807_v10 = vsel %vm462_vm0, %v803_v3, 0.0  ;;  %v808_v11 = vsel %vm462_vm0, %v804_v4, 0.0  ;;  %v810_v13 = vsel %vm462_vm0, %v805_v5, 0.0  ;;  %v812_v15 = vsel %vm462_vm0, %v806_v6, 0.0 }
 0x313   : > { %v809_v12 = vadd.f32 %v808_v11, %v807_v10 }
 0x315   : > { %v811_v14 = vadd.f32 %v810_v13, %v809_v12 }
 0x317   : > { %v813_v16 = vadd.f32 %v812_v15, %v811_v14 }
 0x319   : > { %v814_v17 = vrot.slane %v813_v16, 4 }
 0x31b   : > { %v815_v18 = vadd.f32 %v814_v17, %v813_v16 }
 0x31d   : > { %v816_v19 = vrot.slane %v815_v18, 2 }
 0x31f   : > { %v817_v20 = vadd.f32 %v816_v19, %v815_v18 }
 0x321   : > { %v818_v21 = vrot.slane %v817_v20, 1 }
 0x323   : > { %v819_v22 = vadd.f32 %v818_v21, %v817_v20 }
 0x325   : > { %v820_v23 = vmul.f32 0.03125, %v819_v22 }
 0x327   : > { %v821_v24 = vadd.f32 1e-05, %v820_v23 }
 0x329   : > { %2266 = vrsqrt.f32 %v821_v24 }
 0x336   : > { %v2267_v25 = vpop.eup %2266 }
 0x337   : > { %v825_v27 = vmul.f32 %v2267_v25, %v801_v0  ;;  %v826_v28 = vmul.f32 %v2267_v25, %v802_v1  ;;  %v824_v29 = vmul.f32 %v2267_v25, %v800_v63  ;;  %v823_v33 = vmul.f32 %v2267_v25, %v799_v62  ;;  %v1929_v62 = vld [vmem:[%s2992_s6 + $0x1] ss:$0 sm:$0xff] }
 0x339   : > { %v837_v31 = vmul.f32 %v1916_v26, %v826_v28  ;;  %v836_v32 = vmul.f32 %v1916_v26, %v825_v27  ;;  %v835_v35 = vmul.f32 %v1916_v26, %v824_v29  ;;  %v834_v37 = vmul.f32 %v1916_v26, %v823_v33 }
 0x33b   : > { %v2832_v34 = vadd.f32 %v1917_v30, %v837_v31  ;;  %v2835_v36 = vadd.f32 %v1917_v30, %v836_v32  ;;  %v2839_v38 = vadd.f32 %v1917_v30, %v835_v35  ;;  %v2843_v39 = vadd.f32 %v1917_v30, %v834_v37 }
 0x33d   : > { %2088 = vmatprep.subr.mxu1 %v2832_v34 }
 0x33e   : > { %2089 = vmatpush3.msra.mxu1 %v2832_v34 }
 0x33f   : > { %2090 = vmatprep.subr.mxu1 %v2835_v36 }
 0x340   : > { %2091 = vmatpush3.msra.mxu1 %v2835_v36 }
 0x341   : > { %2092 = vmatprep.subr.mxu1 %v2839_v38 }
 0x342   : > { %2093 = vmatpush3.msra.mxu1 %v2839_v38 }
 0x343   : > { %2094 = vmatprep.subr.mxu1 %v2843_v39 }
 0x344   : > { %2095 = vmatpush3.msra.mxu1 %v2843_v39 }
 0x345   : > { %2097 = vmatmul.mubr.msk.f32.vlgmr.msra.gmra.mxu1 %vm462_vm0, %v2788_v7  ;;  %2116 = vmatprep.subr.mxu1 %v1052_v46 }
 0x346   : > { %2099 = vmatprep.mubr.msk.f32.mxu1 %vm462_vm0, %v2791_v8  ;;  %2117 = vmatpush3.msra.mxu1 %v1052_v46 }
 0x347   : > { %2118 = vmatprep.subr.mxu1 %v1051_v47 }
 0x348   : > { %2119 = vmatpush3.msra.mxu1 %v1051_v47 }
 0x349   : > { %2100 = vmatmul.mubr.msk.f32.gmra.mxu1 %vm462_vm0, %v2798_v9  ;;  %2120 = vmatprep.subr.mxu1 %v1050_v48 }
 0x34a   : > { %2121 = vmatpush3.msra.mxu1 %v1050_v48 }
 0x34b   : > { %2122 = vmatprep.subr.mxu1 %v1049_v49 }
 0x34c   : > { %2123 = vmatpush3.msra.mxu1 %v1049_v49 }
 0x405   : > { %v2098_v42 = vpop.f32.mrf.mxu1 }
 0x407   : > { %v915_v43 = vpop.f32.mrf.mxu1 }
 0x408   : > { %2110 = vmatprep.mubr.msk.f32.mxu0 %vm462_vm0, %v915_v43 }
 0x409   : > { %v2101_v44 = vpop.f32.mrf.mxu1  ;;  %2111 = vmatmul.mubr.msk.f32.vlgmr.msra.gmra.mxu0 %vm462_vm0, %v2098_v42 }
 0x40b   : > { %v925_v45 = vpop.f32.mrf.mxu1 }
 0x40c   : > { %2113 = vmatprep.mubr.msk.f32.mxu0 %vm462_vm0, %v925_v45 }
 0x40d   : > { %2114 = vmatmul.mubr.msk.f32.gmra.mxu0 %vm462_vm0, %v2101_v44 }
 0x40e   : > { %2138 = vmatprep.mubr.msk.f32.mxu0 %vm462_vm0, %v2783_v2 }
 0x4c9   : > { %v2112_v51 = vpop.f32.mrf.mxu0 }
 0x4ca   : > { %v1031_v52 = vadd.f32 %v2112_v51, %v1923_v50 }
 0x4cb   : > { %v1025_v53 = vpop.f32.mrf.mxu0 }
 0x4cc   : > { %v1026_v2 = vadd.f32 %v1923_v50, %v1025_v53  ;;  %v1045_v56 = vmax.f32 %v1031_v52, 0.0 }
 0x4cd   : > { %v2115_v54 = vpop.f32.mrf.mxu0 }
 0x4ce   : > { %v1044_v55 = vmax.f32 %v1026_v2, 0.0  ;;  %v1041_v57 = vadd.f32 %v2115_v54, %v1923_v50 }
 0x4cf   : > { %v1035_v58 = vpop.f32.mrf.mxu0 }
 0x4d0   : > { %v1036_v59 = vadd.f32 %v1923_v50, %v1035_v58  ;;  %2124 = vmatprep.mubr.msk.f32.mxu1 %vm462_vm0, %v1044_v55  ;;  %v1047_v61 = vmax.f32 %v1041_v57, 0.0  ;;  %v1317_v55 = vld [vmem:[#allocation8 + $0x58] sm:$0xff] }
 0x4d1   : > { %2125 = vmatmul.mubr.msk.f32.vlgmr.msra.gmra.mxu1 %vm462_vm0, %v1045_v56  ;;  %v1316_v56 = vld [vmem:[#allocation8 + $0x50] sm:$0xff]  ;;  %2144 = vmatprep.subr.mxu1 %v1317_v55  ;;  %v1935_v58 = vld [vmem:[%s2993_s7 + $0x1] ss:$0 sm:$0xff] }
 0x4d2   : > { %v1046_v60 = vmax.f32 %v1036_v59, 0.0  ;;  %2145 = vmatpush3.msra.mxu1 %v1317_v55 }
 0x4d3   : > { %2146 = vmatprep.subr.mxu1 %v1316_v56 }
 0x4d4   : > { %2127 = vmatprep.mubr.msk.f32.mxu1 %vm462_vm0, %v1046_v60  ;;  %2147 = vmatpush3.msra.mxu1 %v1316_v56 }
 0x4d5   : > { %2128 = vmatmul.mubr.msk.f32.gmra.mxu1 %vm462_vm0, %v1047_v61 }
 0x591   : > { %v2126_v63 = vpop.f32.mrf.mxu1 }
 0x592   : > { %v1145_v0 = vadd.f32 %v2126_v63, %v1929_v62 }
 0x593   : > { %v1139_v1 = vpop.f32.mrf.mxu1 }
 0x594   : > { %v1140_v3 = vadd.f32 %v1929_v62, %v1139_v1  ;;  %v1159_v5 = vmax.f32 %v1145_v0, 0.0 }
 0x595   : > { %v2129_v4 = vpop.f32.mrf.mxu1 }
 0x596   : > { %v1158_v6 = vmax.f32 %v1140_v3, 0.0  ;;  %v1155_v10 = vadd.f32 %v2129_v4, %v1929_v62  ;;  %v1163_v14 = vsel %vm462_vm0, %v1159_v5, 0.0 }
 0x597   : > { %v1149_v11 = vpop.f32.mrf.mxu1 }
 0x598   : > { %v1162_v12 = vsel %vm462_vm0, %v1158_v6, 0.0  ;;  %v1150_v13 = vadd.f32 %v1929_v62, %v1149_v11  ;;  %v1161_v15 = vmax.f32 %v1155_v10, 0.0  ;;  %v1937_v62 = vld [vmem:[%s2994_s8 + $0x1] ss:$0 sm:$0xff] }
 0x599   : > { %v1164_v17 = vadd.f32 %v1163_v14, %v1162_v12  ;;  %v1315_v12 = vld [vmem:[#allocation8 + $0x48] sm:$0xff] }
 0x59a   : > { %v1160_v16 = vmax.f32 %v1150_v13, 0.0  ;;  %v1167_v20 = vsel %vm462_vm0, %v1161_v15, 0.0  ;;  %2148 = vmatprep.subr.mxu1 %v1315_v12  ;;  %v1314_v13 = vld [vmem:[#allocation8 + $0x40] sm:$0xff] }
 0x59b   : > { %2149 = vmatpush3.msra.mxu1 %v1315_v12 }
 0x59c   : > { %v1165_v18 = vsel %vm462_vm0, %v1160_v16, 0.0  ;;  %2150 = vmatprep.subr.mxu1 %v1314_v13 }
 0x59d   : > { %v1166_v19 = vadd.f32 %v1165_v18, %v1164_v17  ;;  %2151 = vmatpush3.msra.mxu1 %v1314_v13  ;;  %v1429_v17 = vld [vmem:[#allocation10 + $0x48] sm:$0xff]  ;;  %v1428_v18 = vld [vmem:[#allocation10 + $0x40] sm:$0xff] }
 0x59f   : > { %v1168_v21 = vadd.f32 %v1167_v20, %v1166_v19  ;;  %v1943_v19 = vld [vmem:[%s2990_s4 + $0x2] ss:$0 sm:$0xff] }
 0x5a1   : > { %v1169_v22 = vrot.slane %v1168_v21, 4 }
 0x5a3   : > { %v1170_v23 = vadd.f32 %v1169_v22, %v1168_v21 }
 0x5a5   : > { %v1171_v24 = vrot.slane %v1170_v23, 2 }
 0x5a7   : > { %v1172_v25 = vadd.f32 %v1171_v24, %v1170_v23 }
 0x5a9   : > { %v1173_v26 = vrot.slane %v1172_v25, 1 }
 0x5ab   : > { %v1174_v27 = vadd.f32 %v1173_v26, %v1172_v25 }
 0x5ad   : > { %v1175_v28 = vmul.f32 0.03125, %v1174_v27 }
 0x5af   : > { %v1176_v29 = vsub.f32 %v1158_v6, %v1175_v28  ;;  %v1177_v30 = vsub.f32 %v1159_v5, %v1175_v28  ;;  %v1178_v31 = vsub.f32 %v1160_v16, %v1175_v28  ;;  %v1179_v32 = vsub.f32 %v1161_v15, %v1175_v28 }
 0x5b1   : > { %v1180_v33 = vmul.f32 %v1176_v29, %v1176_v29  ;;  %v1181_v35 = vmul.f32 %v1177_v30, %v1177_v30  ;;  %v1182_v37 = vmul.f32 %v1178_v31, %v1178_v31  ;;  %v1183_v40 = vmul.f32 %v1179_v32, %v1179_v32 }
 0x5b3   : > { %v1184_v41 = vsel %vm462_vm0, %v1180_v33, 0.0  ;;  %v1185_v42 = vsel %vm462_vm0, %v1181_v35, 0.0  ;;  %v1187_v44 = vsel %vm462_vm0, %v1182_v37, 0.0  ;;  %v1189_v46 = vsel %vm462_vm0, %v1183_v40, 0.0 }
 0x5b4   : > { %v1186_v43 = vadd.f32 %v1185_v42, %v1184_v41 }
 0x5b6   : > { %v1188_v45 = vadd.f32 %v1187_v44, %v1186_v43 }
 0x5b8   : > { %v1190_v47 = vadd.f32 %v1189_v46, %v1188_v45 }
 0x5ba   : > { %v1191_v48 = vrot.slane %v1190_v47, 4 }
 0x5bc   : > { %v1192_v49 = vadd.f32 %v1191_v48, %v1190_v47 }
 0x5be   : > { %v1193_v50 = vrot.slane %v1192_v49, 2 }
 0x5c0   : > { %v1194_v51 = vadd.f32 %v1193_v50, %v1192_v49 }
 0x5c2   : > { %v1195_v52 = vrot.slane %v1194_v51, 1 }
 0x5c4   : > { %v1196_v53 = vadd.f32 %v1195_v52, %v1194_v51 }
 0x5c6   : > { %v1197_v2 = vmul.f32 0.03125, %v1196_v53 }
 0x5c8   : > { %v1198_v54 = vadd.f32 1e-05, %v1197_v2 }
 0x5ca   : > { %2268 = vrsqrt.f32 %v1198_v54 }
 0x5d7   : > { %v2269_v57 = vpop.eup %2268 }
 0x5d8   : > { %v1202_v59 = vmul.f32 %v2269_v57, %v1178_v31  ;;  %v1203_v60 = vmul.f32 %v2269_v57, %v1179_v32  ;;  %v1201_v61 = vmul.f32 %v2269_v57, %v1177_v30  ;;  %v1200_v1 = vmul.f32 %v2269_v57, %v1176_v29  ;;  %v1949_v32 = vld [vmem:[%s2992_s6 + $0x2] ss:$0 sm:$0xff] }
 0x5da   : > { %v1215_v63 = vmul.f32 %v1935_v58, %v1203_v60  ;;  %v1214_v0 = vmul.f32 %v1935_v58, %v1202_v59  ;;  %v1213_v5 = vmul.f32 %v1935_v58, %v1201_v61  ;;  %v1212_v6 = vmul.f32 %v1935_v58, %v1200_v1 }
 0x5dc   : > { %v1227_v3 = vadd.f32 %v1937_v62, %v1215_v63  ;;  %v1226_v4 = vadd.f32 %v1937_v62, %v1214_v0  ;;  %v2886_v10 = vadd.f32 %v1937_v62, %v1213_v5  ;;  %v2889_v11 = vadd.f32 %v1937_v62, %v1212_v6 }
 0x5de   : > { %1617 = vrot.lane.b32.xlu0 %v1227_v3, %s2491_s14  ;;  %2130 = vmatprep.subr.mxu0 %v1227_v3 }
 0x5df   : > { %1615 = vrot.lane.b32.xlu1 %v1226_v4, %s2491_s14  ;;  %2131 = vmatpush3.msra.mxu0 %v1227_v3 }
 0x5e0   : > { %2132 = vmatprep.subr.mxu0 %v1226_v4 }
 0x5e1   : > { %2133 = vmatpush3.msra.mxu0 %v1226_v4 }
 0x5e2   : > { %2134 = vmatprep.subr.mxu0 %v2886_v10 }
 0x5e3   : > { %2135 = vmatpush3.msra.mxu0 %v2886_v10 }
 0x5e4   : > { %2136 = vmatprep.subr.mxu0 %v2889_v11 }
 0x5e5   : > { %2137 = vmatpush3.msra.mxu0 %v2889_v11 }
 0x5e6   : > { %2139 = vmatmul.mubr.msk.f32.vlgmr.msra.gmra.mxu0 %vm462_vm0, %v2788_v7 }
 0x5e7   : > { %2141 = vmatprep.mubr.msk.f32.mxu0 %vm462_vm0, %v2791_v8  ;;  %v1431_v8 = vld [vmem:[#allocation10 + $0x58] sm:$0xff] }
 0x5e8   : > { %2158 = vmatprep.subr.mxu0 %v1431_v8 }
 0x5e9   : > { %2159 = vmatpush3.msra.mxu0 %v1431_v8 }
 0x5ea   : > { %2142 = vmatmul.mubr.msk.f32.gmra.mxu0 %vm462_vm0, %v2798_v9  ;;  %v1430_v9 = vld [vmem:[#allocation10 + $0x50] sm:$0xff] }
 0x5eb   : > { %2160 = vmatprep.subr.mxu0 %v1430_v9 }
 0x5ec   : > { %2161 = vmatpush3.msra.mxu0 %v1430_v9 }
 0x5ed   : > { %2162 = vmatprep.subr.mxu0 %v1429_v17 }
 0x5ee   : > { %2163 = vmatpush3.msra.mxu0 %v1429_v17 }
 0x5ef   : > { %2164 = vmatprep.subr.mxu0 %v1428_v18 }
 0x5f0   : > { %2165 = vmatpush3.msra.mxu0 %v1428_v18 }
 0x6a6   : > { %v2140_v14 = vpop.f32.mrf.mxu0 }
 0x6a8   : > { %v1294_v15 = vpop.f32.mrf.mxu0 }
 0x6a9   : > { %2152 = vmatprep.mubr.msk.f32.mxu1 %vm462_vm0, %v1294_v15 }
 0x6aa   : > { %v2143_v16 = vpop.f32.mrf.mxu0  ;;  %2153 = vmatmul.mubr.msk.f32.vlgmr.msra.gmra.mxu1 %vm462_vm0, %v2140_v14 }
 0x6ac   : > { %v1304_v7 = vpop.f32.mrf.mxu0 }
 0x6ad   : > { %2155 = vmatprep.mubr.msk.f32.mxu1 %vm462_vm0, %v1304_v7 }
 0x6ae   : > { %2156 = vmatmul.mubr.msk.f32.gmra.mxu1 %vm462_vm0, %v2143_v16 }
 0x76a   : > { %v2154_v20 = vpop.f32.mrf.mxu1 }
 0x76b   : > { %v1410_v21 = vadd.f32 %v2154_v20, %v1943_v19 }
 0x76c   : > { %v1404_v22 = vpop.f32.mrf.mxu1 }
 0x76d   : > { %v1405_v23 = vadd.f32 %v1943_v19, %v1404_v22  ;;  %v1424_v26 = vmax.f32 %v1410_v21, 0.0 }
 0x76e   : > { %v2157_v24 = vpop.f32.mrf.mxu1 }
 0x76f   : > { %v1423_v25 = vmax.f32 %v1405_v23, 0.0  ;;  %v1420_v27 = vadd.f32 %v2157_v24, %v1943_v19  ;;  %v2492_v24 = vmov 0.0  }
 0x770   : > { %v1414_v28 = vpop.f32.mrf.mxu1  ;;  %2172 = vmatprep.subr.mxu1 %v2492_v24  ;;  %2180 = vmatprep.mubr.msk.f32.mxu1 %vm2493_vm1, %v2492_v24 }
 0x771   : > { %v1415_v29 = vadd.f32 %v1943_v19, %v1414_v28  ;;  %2166 = vmatprep.mubr.msk.f32.mxu0 %vm462_vm0, %v1423_v25  ;;  %v1426_v31 = vmax.f32 %v1420_v27, 0.0 }
 0x772   : > { %2167 = vmatmul.mubr.msk.f32.vlgmr.msra.gmra.mxu0 %vm462_vm0, %v1424_v26  ;;  %v1955_v26 = vld [vmem:[%s2993_s7 + $0x2] ss:$0 sm:$0xff] }
 0x773   : > { %v1425_v30 = vmax.f32 %v1415_v29, 0.0 }
 0x775   : > { %2169 = vmatprep.mubr.msk.f32.mxu0 %vm462_vm0, %v1425_v30  ;;  %v1957_v30 = vld [vmem:[%s2994_s8 + $0x2] ss:$0 sm:$0xff] }
 0x776   : > { %2170 = vmatmul.mubr.msk.f32.gmra.mxu0 %vm462_vm0, %v1426_v31 }
 0x832   : > { %v2168_v33 = vpop.f32.mrf.mxu0 }
 0x833   : > { %v1524_v35 = vadd.f32 %v2168_v33, %v1949_v32 }
 0x834   : > { %v1518_v37 = vpop.f32.mrf.mxu0 }
 0x835   : > { %v1519_v40 = vadd.f32 %v1949_v32, %v1518_v37  ;;  %v1538_v42 = vmax.f32 %v1524_v35, 0.0 }
 0x836   : > { %v2171_v41 = vpop.f32.mrf.mxu0 }
 0x837   : > { %v1537_v43 = vmax.f32 %v1519_v40, 0.0  ;;  %v1534_v44 = vadd.f32 %v2171_v41, %v1949_v32  ;;  %v1542_v48 = vsel %vm462_vm0, %v1538_v42, 0.0 }
 0x838   : > { %v1528_v45 = vpop.f32.mrf.mxu0 }
 0x839   : > { %v1541_v46 = vsel %vm462_vm0, %v1537_v43, 0.0  ;;  %v1529_v47 = vadd.f32 %v1949_v32, %v1528_v45  ;;  %v1540_v49 = vmax.f32 %v1534_v44, 0.0  ;;  %v1618_v44 = vpop.permute.xlu0 %1617  ;;  %v1616_v45 = vpop.permute.xlu1 %1615 }
 0x83a   : > { %v1543_v51 = vadd.f32 %v1542_v48, %v1541_v46  ;;  %v1642_v46 = vsel %vm462_vm0, %v2832_v34, %v1618_v44 }
 0x83b   : > { %v1539_v50 = vmax.f32 %v1529_v47, 0.0  ;;  %v1546_v2 = vsel %vm462_vm0, %v1540_v49, 0.0 }
 0x83d   : > { %v1544_v52 = vsel %vm462_vm0, %v1539_v50, 0.0 }
 0x83e   : > { %v1545_v53 = vadd.f32 %v1544_v52, %v1543_v51 }
 0x840   : > { %v1547_v54 = vadd.f32 %v1546_v2, %v1545_v53 }
 0x842   : > { %v1548_v55 = vrot.slane %v1547_v54, 4 }
 0x844   : > { %v1549_v56 = vadd.f32 %v1548_v55, %v1547_v54  ;;  %v1653_v54 = vld [vmem:[%s2776_s17] sm:$0xf]  ;;  %s453_s17 = scalar_lea.vmem [#allocation11], %s1898_s22 }
 0x845   : > { %s1750_s25 = sshll.u32 %s453_s17, 4  ;;  %s1751_s25 = int_to_ptr.vmem [resolvable:$true] %s1750_s25 }
 0x846   : > { %v1550_v57 = vrot.slane %v1549_v56, 2  ;;  %s2410_s9 = scalar_lea.vmem %s1751_s25, 64 }
 0x847   : > { %p2411_p6 = scmp.ne.s32.totalorder %s1751_s25, %s2410_s9 }
 0x848   : > { %v1551_v58 = vadd.f32 %v1550_v57, %v1549_v56 }
 0x849   : > { %p2412_p13 = pnand %p2411_p6, %p3052_p11 }
 0x84a   : > { %v1552_v59 = vrot.slane %v1551_v58, 1 }
 0x84b   : > { %p2413_p2 = pneg %p2412_p13 }
 0x84c   : > { %v1553_v60 = vadd.f32 %v1552_v59, %v1551_v58 }
 0x84e   : > { %v1554_v61 = vmul.f32 0.03125, %v1553_v60 }
 0x850   : > { %v1555_v62 = vsub.f32 %v1537_v43, %v1554_v61  ;;  %v1556_v63 = vsub.f32 %v1538_v42, %v1554_v61  ;;  %v1557_v0 = vsub.f32 %v1539_v50, %v1554_v61  ;;  %v1558_v1 = vsub.f32 %v1540_v49, %v1554_v61 }
 0x852   : > { %v1559_v3 = vmul.f32 %v1555_v62, %v1555_v62  ;;  %v1560_v4 = vmul.f32 %v1556_v63, %v1556_v63  ;;  %v1561_v5 = vmul.f32 %v1557_v0, %v1557_v0  ;;  %v1562_v6 = vmul.f32 %v1558_v1, %v1558_v1 }
 0x854   : > { %v1563_v12 = vsel %vm462_vm0, %v1559_v3, 0.0  ;;  %v1564_v13 = vsel %vm462_vm0, %v1560_v4, 0.0  ;;  %v1566_v15 = vsel %vm462_vm0, %v1561_v5, 0.0  ;;  %v1568_v7 = vsel %vm462_vm0, %v1562_v6, 0.0 }
 0x855   : > { %v1565_v14 = vadd.f32 %v1564_v13, %v1563_v12 }
 0x857   : > { %v1567_v16 = vadd.f32 %v1566_v15, %v1565_v14 }
 0x859   : > { %v1569_v8 = vadd.f32 %v1568_v7, %v1567_v16 }
 0x85b   : > { %v1570_v9 = vrot.slane %v1569_v8, 4 }
 0x85d   : > { %v1571_v17 = vadd.f32 %v1570_v9, %v1569_v8 }
 0x85f   : > { %v1572_v18 = vrot.slane %v1571_v17, 2 }
 0x861   : > { %v1573_v19 = vadd.f32 %v1572_v18, %v1571_v17 }
 0x863   : > { %v1574_v20 = vrot.slane %v1573_v19, 1 }
 0x865   : > { %v1575_v21 = vadd.f32 %v1574_v20, %v1573_v19 }
 0x867   : > { %v1576_v22 = vmul.f32 0.03125, %v1575_v21 }
 0x869   : > { %v1577_v23 = vadd.f32 1e-05, %v1576_v22 }
 0x86b   : > { %2270 = vrsqrt.f32 %v1577_v23 }
 0x878   : > { %v2271_v25 = vpop.eup %2270 }
 0x879   : > { %v1581_v27 = vmul.f32 %v2271_v25, %v1557_v0  ;;  %v1582_v28 = vmul.f32 %v2271_v25, %v1558_v1  ;;  %v1580_v29 = vmul.f32 %v2271_v25, %v1556_v63  ;;  %v1579_v40 = vmul.f32 %v2271_v25, %v1555_v62 }
 0x87b   : > { %v1594_v31 = vmul.f32 %v1955_v26, %v1582_v28  ;;  %v1593_v32 = vmul.f32 %v1955_v26, %v1581_v27  ;;  %v1592_v37 = vmul.f32 %v1955_v26, %v1580_v29  ;;  %v1591_v42 = vmul.f32 %v1955_v26, %v1579_v40 }
 0x87d   : > { %v1606_v33 = vadd.f32 %v1957_v30, %v1594_v31  ;;  %v1605_v35 = vadd.f32 %v1957_v30, %v1593_v32  ;;  %v1604_v41 = vadd.f32 %v1957_v30, %v1592_v37  ;;  %v1603_v43 = vadd.f32 %v1957_v30, %v1591_v42 }
 0x87f   : > { %1633 = vrot.lane.b32.xlu0 %v1606_v33, %s2494_s16  ;;  %1631 = vrot.lane.b32.xlu1 %v1605_v35, %s2494_s16 }
 0x883   : > { %1613 = vrot.lane.b32.xlu0 %v2886_v10, %s2491_s14  ;;  %1629 = vrot.lane.b32.xlu1 %v1604_v41, %s2494_s16  ;;  %v1641_v10 = vsel %vm462_vm0, %v2835_v36, %v1616_v45 }
 0x887   : > { %1611 = vrot.lane.b32.xlu0 %v2889_v11, %s2491_s14  ;;  %1627 = vrot.lane.b32.xlu1 %v1603_v43, %s2494_s16  ;;  %s2414_s14 = sshll.u32 %s2495_s21, 4  ;;  %s2415_s14 = int_to_ptr.vmem [resolvable:$false] %s2414_s14 }
 0x888   : > { %s2416_s13 = scalar_lea.vmem %s2415_s14, 128  ;;  %p2417_p9 = scmp.lt.s32.totalorder %s1751_s25, %s2415_s14 }
 0x889   : > { %p2418_p10 = scmp.lt.s32.totalorder %s2416_s13, %s2410_s9 }
 0x88b   : > { %p2419_p1 = por %p2418_p10, %p2417_p9 }
 0x88d   : > { %p2420_p5 = pnand %p2419_p1, %p2413_p2 }
 0x8f1   : > { %v1634_v47 = vpop.permute.xlu0 %1633  ;;  %v1632_v48 = vpop.permute.xlu1 %1631 }
 0x8f2   : > { %v1647_v49 = vsel %vm1643_vm2, %v1642_v46, %v1634_v47  ;;  %v1646_v11 = vsel %vm1643_vm2, %v1641_v10, %v1632_v48 }
 0x8f3   : > { %2173 = vmatpush3.msk.msra.mxu1 %vm1648_vm3, %v1647_v49 }
 0x8f4   : > { %2174 = vmatprep.subr.mxu1 %v2492_v24 }
 0x8f5   : > { %v1614_v50 = vpop.permute.xlu0 %1613  ;;  %2175 = vmatpush3.msk.msra.mxu1 %vm1648_vm3, %v1646_v11  ;;  %v1630_v51 = vpop.permute.xlu1 %1629 }
 0x8f6   : > { %v1640_v34 = vsel %vm462_vm0, %v2839_v38, %v1614_v50  ;;  %2176 = vmatprep.subr.mxu1 %v2492_v24 }
 0x8f7   : > { %v1645_v52 = vsel %vm1643_vm2, %v1640_v34, %v1630_v51 }
 0x8f8   : > { %2177 = vmatpush3.msk.msra.mxu1 %vm1648_vm3, %v1645_v52 }
 0x8f9   : > { %v1612_v53 = vpop.permute.xlu0 %1611  ;;  %v1628_v2 = vpop.permute.xlu1 %1627  ;;  %2178 = vmatprep.subr.mxu1 %v2492_v24 }
 0x8fa   : > { %v1639_v36 = vsel %vm462_vm0, %v2843_v39, %v1612_v53 }
 0x8fb   : > { %v1644_v55 = vsel %vm1643_vm2, %v1639_v36, %v1628_v2 }
 0x8fc   : > { %2179 = vmatpush3.msk.msra.mxu1 %vm1648_vm3, %v1644_v55 }
 0x8fd   : > { %2181 = vmatmul.mubr.msk.f32.vlgmr.msra.gmra.mxu1 %vm462_vm0, %v1653_v54 }
 0x9bd   : > { %v1723_v38 = vpop.f32.mrf.mxu1 }
 0x9be   : > { %v1727_v56 = vmul.f32 %v1723_v38, %v1723_v38 }
 0x9bf   : > { %v2182_v57 = vpop.f32.mrf.mxu1 }
 0x9c0   : > { %v1729_v58 = vsel %vm1728_vm4, %v1727_v56, 0.0 }
 0x9c1   : > { %1730 = vadd.xlane.f32.xlu0 %v1729_v58 }
 0xa4a   : > { %v1731_v59 = vpop.xlane.xlu0 %1730 }
 0xa4b   : > { %v1732_v60 = vmax.f32 %v1731_v59, 1e-24 }
 0xa4d   : > { %2272 = vrsqrt.f32 %v1732_v60 }
 0xa5a   : > { %v2273_v39 = vpop.eup %2272 }
 0xa5b   : > { %v1734_v61 = vmul.f32 %v2273_v39, %v1723_v38 }
 0xa5d   : > { %1735 = vst [vmem:[%s453_s17] sm:$0xf] %v1734_v61 }
 0xa5e   : > { %2423 = shalt.err (!%p2420_p5)
}
 0xa5f   : > { %s2424_s22 = scalar_lea.hbm %s1748_s24, 64  ;;  %s2428_s19 = scalar_lea.hbm %s3051_s29, 512 }
 0xa60   : > { %p2425_p0 = scmp.ne.s32.totalorder %s1748_s24, %s2424_s22  ;;  %p2429_p12 = scmp.lt.s32.totalorder %s1748_s24, %s3051_s29 }
 0xa61   : > { %p2430_p4 = scmp.lt.s32.totalorder %s2428_s19, %s2424_s22 }
 0xa62   : > { %p2426_p3 = pnand %p2425_p0, %p3052_p11 }
 0xa63   : > { %p2431_p8 = por %p2430_p4, %p2429_p12 }
 0xa64   : > { %p2427_p7 = pneg %p2426_p3 }
 0xa66   : > { %p2432_p6 = pnand %p2431_p8, %p2427_p7 }
 0xa68   : > { %2435 = shalt.err (!%p2432_p6)
}
 0xa69   : > { %2197 = dma.vmem_to_hbm [thread:$0]  (%p3052_p11), %s1751_s25, 64, %s1748_s24, %s1737_s30  }
 0xa6a PF: > { %s3053_s3 = sld [smem:[#allocation16_spill]]  ;;  %p2225_p13 = scmp.ge.s32.totalorder %s2482_s12, 2 }
 0xa6b   : > { %s3054_s18 = sld [smem:[#allocation21_spill]] }
 0xa70   : > { %s1762_s11 = sand.u32 1, %s3053_s3  }
 0xa71   : > { %p3055_p2 = scmp.ne.s32.totalorder %s3054_s18, 0  ;;  %s1763_s15 = scalar_lea.sflag [#allocation4], %s1762_s11 }
 0xa73   : > { %p2217_p9 = pnand %p2225_p13, %p3055_p2 }
 0xa75   : > { %p2218_p10 = pneg %p2217_p9 }
 0xa77   : > { %2465 = dma.done.wait (%p2218_p10), %s1763_s15, 64  }
 0xa78   : > { %2467 = vsyncadd (%p2218_p10), %s1763_s15, 4294967232  ;;  %s3056_s12 = sld [smem:[#allocation18_spill]]  ;;  %s3059_s30 = smov %s2474_s10 }
 0xa79   : > { %s3057_s16 = sld [smem:[#allocation17_spill]] }
 0xa7a   : > { %s3058_s11 = sld [smem:[#allocation19_spill]] }
 0xa7e   : > { %p26_p1 = scmp.ge.s32.totalorder %s3056_s12, 10  }
 0xa7f   : > { %s3060_s10 = smov %s3057_s16 }
 0xa80   :  { %28 = sbr.rel (!%p26_p1) target bundleno = 14 (0xe), region = 145 }
 0xa85   :  { %1768 = vsyncpa [#allocation3], 1 }
 0xa86   :  { %1770 = vsyncpa [#allocation3 + $0x1], 1 }
 0xa87   :  { %1771 = vsyncpa [#allocation6], 1 }
 0xa88   :  { %1773 = vsyncpa [#allocation6 + $0x1], 1 }
 0xa89   :  { %1774 = vsyncpa [#allocation9], 1 }
 0xa8a   :  { %1775 = vsyncpa [#allocation4], 1 }
 0xa8b   :  { %1777 = vsyncpa [#allocation4 + $0x1], 1 }

</bundles_post_ra>
